<compile_context>
chip_gen: v7x
topology: tpu7x:2x2x1
jax: 0.10.0
libtpu: 0.0.40
codegen_flags: <defaults>
</compile_context>

<pallas_src>
import functools

import jax
import jax.numpy as jnp
from jax import lax
from jax.experimental import pallas as pl
from jax.experimental.pallas import tpu as pltpu


# ----------------------------------------------------------------------------
# Fused hourglass kernel (one batch-block per grid step)
# ----------------------------------------------------------------------------
def _hourglass_kernel(xs_ref, wf_ref, bf_ref, wm0_ref, bm0_ref, wm1_ref,
                      bm1_ref, wm2_ref, bm2_ref, wr_ref, br_ref, o_ref, *,
                      c_in, h2, w2):
    """Whole hourglass forward for one batch-block, resident in VMEM.

    xs_ref : (1, 4*c_in, L)  space-to-depth packed input; lane index
             g = q*h2*w2 + i*w2 + j  (q = batch element within the block),
             sublane row (a*2+b)*c_in + c  <->  x[q][c, 2i+a, 2j+b]
    w*_ref : (Cout, 9*Cin)  conv weights, BN scale folded in, tap-major columns
    b*_ref : (Cout, 1)      folded BN shift
    o_ref  : (1, 4*c_in, L)  output, same packing as xs_ref
    """
    xs = xs_ref[...][0]                                     # (4*c_in, L) f32
    L = xs.shape[1]
    hw = h2 * w2

    # Per-lane (row, col) position inside its own batch element's h2 x w2 grid.
    flat = lax.broadcasted_iota(jnp.int32, (1, L), 1)
    if (w2 & (w2 - 1)) == 0:
        col = flat & (w2 - 1)
        rowq = flat >> (w2.bit_length() - 1)
    else:
        col = flat % w2
        rowq = flat // w2
    row = (rowq & (h2 - 1)) if (h2 & (h2 - 1)) == 0 else (rowq % h2)

    row_ok = {-1: row > 0, 0: None, 1: row < (h2 - 1)}
    col_ok = {-1: col > 0, 0: None, 1: col < (w2 - 1)}

    def tap_mask(di, dj):
        m = row_ok[di]
        c = col_ok[dj]
        if m is None:
            return c
        return m if c is None else (m & c)

    def shift_flat(x, di, dj):
        # out[c, i*w2 + j] = x[c, (i+di)*w2 + (j+dj)], zero outside the local
        # h2 x w2 grid (masks also kill any cross-batch bleed in the packed
        # lane layout).
        c = x.shape[0]
        s = di * w2 + dj
        if s > 0:
            x = jnp.concatenate([x[:, s:], jnp.zeros((c, s), x.dtype)], axis=1)
        elif s < 0:
            x = jnp.concatenate([jnp.zeros((c, -s), x.dtype), x[:, :L + s]],
                                axis=1)
        m = tap_mask(di, dj)
        if m is not None:
            x = jnp.where(m, x, 0.0)
        return x

    def matmul_bias_relu(xt, w_ref, b_ref):
        y = jnp.dot(w_ref[...], xt,
                    precision=lax.Precision.HIGHEST,
                    preferred_element_type=jnp.float32)
        return jnp.maximum(y + b_ref[...], 0.0)

    def conv3x3_s1(x, w_ref, b_ref):
        # stride-1 3x3 conv (padding=1) + BN + ReLU on the h2 x w2 grid;
        # 9 taps stacked on the contraction axis -> one MXU matmul.
        taps = [shift_flat(x, dh, dw)
                for dh in (-1, 0, 1) for dw in (-1, 0, 1)]
        return matmul_bias_relu(jnp.concatenate(taps, axis=0), w_ref, b_ref)

    def conv3x3_s2_front(w_ref, b_ref):
        # stride-2 3x3 conv (padding=1) on the full-res input, expressed on the
        # polyphase planes: row offset d in {-1,0,1} reads plane a in {1,0,1}
        # with an extra unit shift of -1 when d == -1 (same for columns).
        taps = []
        for d in (-1, 0, 1):
            a, di = (1, -1) if d == -1 else ((0, 0) if d == 0 else (1, 0))
            for e in (-1, 0, 1):
                b, dj = (1, -1) if e == -1 else ((0, 0) if e == 0 else (1, 0))
                p = a * 2 + b
                plane = xs[p * c_in:(p + 1) * c_in, :]
                taps.append(shift_flat(plane, di, dj))
        return matmul_bias_relu(jnp.concatenate(taps, axis=0), w_ref, b_ref)

    front = conv3x3_s2_front(wf_ref, bf_ref)                # (c_mid, L)
    mid = conv3x3_s1(front, wm0_ref, bm0_ref)
    mid = conv3x3_s1(mid, wm1_ref, bm1_ref)
    mid = conv3x3_s1(mid, wm2_ref, bm2_ref)
    rear = conv3x3_s1(mid, wr_ref, br_ref)                  # (c_in, L)

    # nearest 2x upsample + residual add: in the space-to-depth packing every
    # polyphase plane of the output receives the same `rear` value.
    up = jnp.concatenate([rear, rear, rear, rear], axis=0)  # (4*c_in, L)
    o_ref[...] = (xs + up)[None, :, :]


# ----------------------------------------------------------------------------
# Wrapper
# ----------------------------------------------------------------------------
def _fold_conv_params(p):
    """(3,3,Cin,Cout) conv + BN scale/shift -> (Cout, 9*Cin), (Cout, 1)."""
    cin, cout = p["w"].shape[2], p["w"].shape[3]
    w = (p["w"] * p["scale"].reshape(1, 1, 1, cout)).reshape(9 * cin, cout)
    return w.T, p["shift"].reshape(cout, 1)


def hourglass_forward(x_nchw, params):
    """x_nchw: (N, C, H, W) float32, H and W even. Returns (N, C, H, W)."""
    n, c, h, w = x_nchw.shape
    assert h % 2 == 0 and w % 2 == 0
    h2, w2 = h // 2, w // 2
    hw = h2 * w2

    # Space-to-depth (polyphase) packing: NCHW -> (N, 4*C, (H/2)*(W/2)).
    xs = x_nchw.reshape(n, c, h2, 2, w2, 2)
    xs = jnp.transpose(xs, (0, 3, 5, 1, 2, 4)).reshape(n, 4 * c, hw)

    # Pack `bb` batch elements along the lane axis so each grid step works on
    # a lane-dense (>=128 wide) slab.
    bb = max(1, min(n, -(-128 // hw)))           # ceil(128 / hw), capped at n
    n_blocks = -(-n // bb)
    n_pad = n_blocks * bb
    if n_pad != n:
        xs = jnp.concatenate(
            [xs, jnp.zeros((n_pad - n, 4 * c, hw), xs.dtype)], axis=0)
    lanes = bb * hw
    xs = xs.reshape(n_blocks, bb, 4 * c, hw)
    xs = jnp.transpose(xs, (0, 2, 1, 3)).reshape(n_blocks, 4 * c, lanes)

    wf, bf = _fold_conv_params(params["front"])
    (wm0, bm0), (wm1, bm1), (wm2, bm2) = [
        _fold_conv_params(p) for p in params["middle"]]
    wr, br = _fold_conv_params(params["rear"])

    def const_spec(a):
        return pl.BlockSpec(a.shape, lambda b: (0, 0))

    kernel = functools.partial(_hourglass_kernel, c_in=c, h2=h2, w2=w2)
    out_s2d = pl.pallas_call(
        kernel,
        out_shape=jax.ShapeDtypeStruct((n_blocks, 4 * c, lanes), jnp.float32),
        grid=(n_blocks,),
        in_specs=[pl.BlockSpec((1, 4 * c, lanes), lambda b: (b, 0, 0)),
                  const_spec(wf), const_spec(bf),
                  const_spec(wm0), const_spec(bm0),
                  const_spec(wm1), const_spec(bm1),
                  const_spec(wm2), const_spec(bm2),
                  const_spec(wr), const_spec(br)],
        out_specs=pl.BlockSpec((1, 4 * c, lanes), lambda b: (b, 0, 0)),
        compiler_params=pltpu.CompilerParams(
            dimension_semantics=("parallel",)),
    )(xs, wf, bf, wm0, bm0, wm1, bm1, wm2, bm2, wr, br)

    # Undo the batch packing and the space-to-depth packing on the output.
    out = out_s2d.reshape(n_blocks, 4 * c, bb, hw)
    out = jnp.transpose(out, (0, 2, 1, 3)).reshape(n_pad, 4 * c, hw)[:n]
    out = out.reshape(n, 2, 2, c, h2, w2)
    out = jnp.transpose(out, (0, 3, 4, 1, 5, 2)).reshape(n, c, h, w)
    return out


# ----------------------------------------------------------------------------
# Deterministic parameters (weights + eval-mode BatchNorm folded to scale/shift)
# ----------------------------------------------------------------------------
def init_sp_params(key, cin, cout):
    kw, kg = jax.random.split(key)
    w = (jax.random.normal(kw, (3, 3, cin, cout), jnp.float32)
         * (1.0 / (3.0 * float(cin) ** 0.5)))
    gamma = 1.0 + 0.1 * jax.random.normal(kg, (cout,), jnp.float32)
    beta = 0.05 * jnp.arange(cout, dtype=jnp.float32)
    running_mean = jnp.zeros((cout,), jnp.float32)
    running_var = jnp.ones((cout,), jnp.float32)
    eps = 1e-5
    scale = gamma / jnp.sqrt(running_var + eps)
    shift = beta - running_mean * scale
    return {"w": w, "scale": scale, "shift": shift}


def init_hourglass_params(key, encoder_dim):
    assert len(encoder_dim) == 2, "fused kernel covers the depth-1 hourglass"
    curr, nxt = encoder_dim
    keys = jax.random.split(key, 5)
    return {"front": init_sp_params(keys[0], curr, nxt),
            "middle": [init_sp_params(keys[2 + i], nxt, nxt) for i in range(3)],
            "rear": init_sp_params(keys[1], nxt, curr)}


# ----------------------------------------------------------------------------
# Pure-JAX reference for validation
# ----------------------------------------------------------------------------
def _ref_sp(x, p, stride):
    out = lax.conv_general_dilated(
        x, p["w"], window_strides=(stride, stride), padding=((1, 1), (1, 1)),
        dimension_numbers=("NCHW", "HWIO", "NCHW"),
        precision=lax.Precision.HIGHEST)
    out = out * p["scale"].reshape(1, -1, 1, 1) + p["shift"].reshape(1, -1, 1, 1)
    return jnp.maximum(out, 0.0)


def _ref_forward(x, params):
    front = _ref_sp(x, params["front"], 2)
    mid = front
    for p in params["middle"]:
        mid = _ref_sp(mid, p, 1)
    rear = _ref_sp(mid, params["rear"], 1)
    up = jnp.repeat(jnp.repeat(rear, 2, axis=2), 2, axis=3)   # nearest 2x
    return x + up


# ----------------------------------------------------------------------------
if __name__ == "__main__":
    key = jax.random.PRNGKey(0)
    k_x, k_p = jax.random.split(key)

    encoder_dim = [4, 8]   # Hourglass(encoder_dim=[4, 8], group_id=1, device)
    x = jax.random.normal(k_x, (2, encoder_dim[0], 16, 16), jnp.float32)  # NCHW
    params = init_hourglass_params(k_p, encoder_dim)

    out = jax.block_until_ready(jax.jit(hourglass_forward)(x, params))

    ref = _ref_forward(x, params)
    assert out.shape == x.shape and out.dtype == x.dtype
    max_err = float(jnp.max(jnp.abs(out - ref)))
    if max_err > 1e-3:   # HIGHEST-precision matmuls on both sides
        raise AssertionError(f"mismatch vs reference: max_abs_err={max_err}")

    print("KERNEL_OK")
</pallas_src>

<mosaic_0001>
module attributes {stable_mosaic.version = 11 : i64} {
  func.func @_hourglass_kernel(%arg0: i32, %arg1: memref<1x16x128xf32, #tpu.memory_space<vmem>>, %arg2: memref<8x36xf32, #tpu.memory_space<vmem>>, %arg3: memref<8x1xf32, #tpu.memory_space<vmem>>, %arg4: memref<8x72xf32, #tpu.memory_space<vmem>>, %arg5: memref<8x1xf32, #tpu.memory_space<vmem>>, %arg6: memref<8x72xf32, #tpu.memory_space<vmem>>, %arg7: memref<8x1xf32, #tpu.memory_space<vmem>>, %arg8: memref<8x72xf32, #tpu.memory_space<vmem>>, %arg9: memref<8x1xf32, #tpu.memory_space<vmem>>, %arg10: memref<4x72xf32, #tpu.memory_space<vmem>>, %arg11: memref<4x1xf32, #tpu.memory_space<vmem>>, %arg12: memref<1x16x128xf32, #tpu.memory_space<vmem>>) attributes {dimension_semantics = [#tpu.dimension_semantics<parallel>], iteration_bounds = array<i64: 1>, scalar_prefetch = 0 : i64, scratch_operands = 0 : i64, tpu.core_type = #tpu.core_type<tc>, window_params = [{transform_indices = @transform_0, window_bounds = array<i64: 1, 16, 128>}, {pipeline_mode = #tpu.pipeline_mode<synchronous>, transform_indices = @transform_1, window_bounds = array<i64: 8, 36>}, {pipeline_mode = #tpu.pipeline_mode<synchronous>, transform_indices = @transform_2, window_bounds = array<i64: 8, 1>}, {pipeline_mode = #tpu.pipeline_mode<synchronous>, transform_indices = @transform_3, window_bounds = array<i64: 8, 72>}, {pipeline_mode = #tpu.pipeline_mode<synchronous>, transform_indices = @transform_4, window_bounds = array<i64: 8, 1>}, {pipeline_mode = #tpu.pipeline_mode<synchronous>, transform_indices = @transform_5, window_bounds = array<i64: 8, 72>}, {pipeline_mode = #tpu.pipeline_mode<synchronous>, transform_indices = @transform_6, window_bounds = array<i64: 8, 1>}, {pipeline_mode = #tpu.pipeline_mode<synchronous>, transform_indices = @transform_7, window_bounds = array<i64: 8, 72>}, {pipeline_mode = #tpu.pipeline_mode<synchronous>, transform_indices = @transform_8, window_bounds = array<i64: 8, 1>}, {pipeline_mode = #tpu.pipeline_mode<synchronous>, transform_indices = @transform_9, window_bounds = array<i64: 4, 72>}, {pipeline_mode = #tpu.pipeline_mode<synchronous>, transform_indices = @transform_10, window_bounds = array<i64: 4, 1>}, {transform_indices = @transform_11, window_bounds = array<i64: 1, 16, 128>}]} {
    %c0 = arith.constant 0 : index
    %c0_0 = arith.constant 0 : index
    %c0_1 = arith.constant 0 : index
    %0 = vector.load %arg1[%c0, %c0_0, %c0_1] : memref<1x16x128xf32, #tpu.memory_space<vmem>>, vector<1x16x128xf32>
    %1 = vector.shape_cast %0 : vector<1x16x128xf32> to vector<16x128xf32>
    %2 = tpu.iota {dimensions = array<i32: 1>} : vector<1x128xi32>
    %c7_i32 = arith.constant 7 : i32
    %3 = vector.broadcast %c7_i32 : i32 to vector<1x128xi32>
    %4 = arith.andi %2, %3 : vector<1x128xi32>
    %c3_i32 = arith.constant 3 : i32
    %5 = vector.broadcast %c3_i32 : i32 to vector<1x128xi32>
    %6 = arith.shrsi %2, %5 : vector<1x128xi32>
    %c7_i32_2 = arith.constant 7 : i32
    %7 = vector.broadcast %c7_i32_2 : i32 to vector<1x128xi32>
    %8 = arith.andi %6, %7 : vector<1x128xi32>
    %c0_i32 = arith.constant 0 : i32
    %9 = vector.broadcast %c0_i32 : i32 to vector<1x128xi32>
    %10 = arith.cmpi sgt, %8, %9 : vector<1x128xi32>
    %c7_i32_3 = arith.constant 7 : i32
    %11 = vector.broadcast %c7_i32_3 : i32 to vector<1x128xi32>
    %12 = arith.cmpi slt, %8, %11 : vector<1x128xi32>
    %c0_i32_4 = arith.constant 0 : i32
    %13 = vector.broadcast %c0_i32_4 : i32 to vector<1x128xi32>
    %14 = arith.cmpi sgt, %4, %13 : vector<1x128xi32>
    %c7_i32_5 = arith.constant 7 : i32
    %15 = vector.broadcast %c7_i32_5 : i32 to vector<1x128xi32>
    %16 = arith.cmpi slt, %4, %15 : vector<1x128xi32>
    %17 = vector.extract_strided_slice %1 {offsets = [12, 0], sizes = [4, 128], strides = [1, 1]} : vector<16x128xf32> to vector<4x128xf32>
    %cst = arith.constant 0.000000e+00 : f32
    %18 = vector.broadcast %cst : f32 to vector<4x9xf32>
    %19 = vector.extract_strided_slice %17 {offsets = [0, 0], sizes = [4, 119], strides = [1, 1]} : vector<4x128xf32> to vector<4x119xf32>
    %20 = tpu.concatenate %18, %19 in 1 : vector<4x9xf32>, vector<4x119xf32> -> vector<4x128xf32>
    %21 = arith.andi %10, %14 : vector<1x128xi1>
    %cst_6 = arith.constant 0.000000e+00 : f32
    %22 = vector.shape_cast %21 : vector<1x128xi1> to vector<1x128xi1>
    %23 = vector.broadcast %22 : vector<1x128xi1> to vector<4x128xi1>
    %24 = vector.broadcast %cst_6 : f32 to vector<4x128xf32>
    %25 = arith.select %23, %20, %24 : vector<4x128xi1>, vector<4x128xf32>
    %26 = vector.extract_strided_slice %1 {offsets = [8, 0], sizes = [4, 128], strides = [1, 1]} : vector<16x128xf32> to vector<4x128xf32>
    %cst_7 = arith.constant 0.000000e+00 : f32
    %27 = vector.broadcast %cst_7 : f32 to vector<4x8xf32>
    %28 = vector.extract_strided_slice %26 {offsets = [0, 0], sizes = [4, 120], strides = [1, 1]} : vector<4x128xf32> to vector<4x120xf32>
    %29 = tpu.concatenate %27, %28 in 1 : vector<4x8xf32>, vector<4x120xf32> -> vector<4x128xf32>
    %cst_8 = arith.constant 0.000000e+00 : f32
    %30 = vector.shape_cast %10 : vector<1x128xi1> to vector<1x128xi1>
    %31 = vector.broadcast %30 : vector<1x128xi1> to vector<4x128xi1>
    %32 = vector.broadcast %cst_8 : f32 to vector<4x128xf32>
    %33 = arith.select %31, %29, %32 : vector<4x128xi1>, vector<4x128xf32>
    %34 = vector.extract_strided_slice %1 {offsets = [12, 0], sizes = [4, 128], strides = [1, 1]} : vector<16x128xf32> to vector<4x128xf32>
    %cst_9 = arith.constant 0.000000e+00 : f32
    %35 = vector.broadcast %cst_9 : f32 to vector<4x8xf32>
    %36 = vector.extract_strided_slice %34 {offsets = [0, 0], sizes = [4, 120], strides = [1, 1]} : vector<4x128xf32> to vector<4x120xf32>
    %37 = tpu.concatenate %35, %36 in 1 : vector<4x8xf32>, vector<4x120xf32> -> vector<4x128xf32>
    %cst_10 = arith.constant 0.000000e+00 : f32
    %38 = vector.shape_cast %10 : vector<1x128xi1> to vector<1x128xi1>
    %39 = vector.broadcast %38 : vector<1x128xi1> to vector<4x128xi1>
    %40 = vector.broadcast %cst_10 : f32 to vector<4x128xf32>
    %41 = arith.select %39, %37, %40 : vector<4x128xi1>, vector<4x128xf32>
    %42 = vector.extract_strided_slice %1 {offsets = [4, 0], sizes = [4, 128], strides = [1, 1]} : vector<16x128xf32> to vector<4x128xf32>
    %cst_11 = arith.constant 0.000000e+00 : f32
    %43 = vector.broadcast %cst_11 : f32 to vector<4x1xf32>
    %44 = vector.extract_strided_slice %42 {offsets = [0, 0], sizes = [4, 127], strides = [1, 1]} : vector<4x128xf32> to vector<4x127xf32>
    %45 = tpu.concatenate %43, %44 in 1 : vector<4x1xf32>, vector<4x127xf32> -> vector<4x128xf32>
    %cst_12 = arith.constant 0.000000e+00 : f32
    %46 = vector.shape_cast %14 : vector<1x128xi1> to vector<1x128xi1>
    %47 = vector.broadcast %46 : vector<1x128xi1> to vector<4x128xi1>
    %48 = vector.broadcast %cst_12 : f32 to vector<4x128xf32>
    %49 = arith.select %47, %45, %48 : vector<4x128xi1>, vector<4x128xf32>
    %50 = vector.extract_strided_slice %1 {offsets = [0, 0], sizes = [4, 128], strides = [1, 1]} : vector<16x128xf32> to vector<4x128xf32>
    %51 = vector.extract_strided_slice %1 {offsets = [4, 0], sizes = [4, 128], strides = [1, 1]} : vector<16x128xf32> to vector<4x128xf32>
    %52 = vector.extract_strided_slice %1 {offsets = [12, 0], sizes = [4, 128], strides = [1, 1]} : vector<16x128xf32> to vector<4x128xf32>
    %cst_13 = arith.constant 0.000000e+00 : f32
    %53 = vector.broadcast %cst_13 : f32 to vector<4x1xf32>
    %54 = vector.extract_strided_slice %52 {offsets = [0, 0], sizes = [4, 127], strides = [1, 1]} : vector<4x128xf32> to vector<4x127xf32>
    %55 = tpu.concatenate %53, %54 in 1 : vector<4x1xf32>, vector<4x127xf32> -> vector<4x128xf32>
    %cst_14 = arith.constant 0.000000e+00 : f32
    %56 = vector.shape_cast %14 : vector<1x128xi1> to vector<1x128xi1>
    %57 = vector.broadcast %56 : vector<1x128xi1> to vector<4x128xi1>
    %58 = vector.broadcast %cst_14 : f32 to vector<4x128xf32>
    %59 = arith.select %57, %55, %58 : vector<4x128xi1>, vector<4x128xf32>
    %60 = vector.extract_strided_slice %1 {offsets = [8, 0], sizes = [4, 128], strides = [1, 1]} : vector<16x128xf32> to vector<4x128xf32>
    %61 = vector.extract_strided_slice %1 {offsets = [12, 0], sizes = [4, 128], strides = [1, 1]} : vector<16x128xf32> to vector<4x128xf32>
    %62 = tpu.concatenate %25, %33, %41, %49, %50, %51, %59, %60, %61 in 0 : vector<4x128xf32>, vector<4x128xf32>, vector<4x128xf32>, vector<4x128xf32>, vector<4x128xf32>, vector<4x128xf32>, vector<4x128xf32>, vector<4x128xf32>, vector<4x128xf32> -> vector<36x128xf32>
    %c0_15 = arith.constant 0 : index
    %c0_16 = arith.constant 0 : index
    %63 = vector.load %arg2[%c0_15, %c0_16] : memref<8x36xf32, #tpu.memory_space<vmem>>, vector<8x36xf32>
    %cst_17 = arith.constant dense<0.000000e+00> : vector<8x128xf32>
    %64 = tpu.matmul %63, %62, %cst_17 {dimension_numbers = #tpu.dot_dimension_numbers<[1], [0], [0], [1], [0, 0, 1, 1], [], []>, precision = #tpu.contract_precision<fp32>} : vector<8x36xf32>, vector<36x128xf32>, vector<8x128xf32> -> vector<8x128xf32>
    %c0_18 = arith.constant 0 : index
    %c0_19 = arith.constant 0 : index
    %65 = vector.load %arg3[%c0_18, %c0_19] : memref<8x1xf32, #tpu.memory_space<vmem>>, vector<8x1xf32>
    %66 = vector.broadcast %65 : vector<8x1xf32> to vector<8x128xf32>
    %67 = arith.addf %64, %66 : vector<8x128xf32>
    %cst_20 = arith.constant 0.000000e+00 : f32
    %68 = vector.broadcast %cst_20 : f32 to vector<8x128xf32>
    %69 = arith.maximumf %67, %68 : vector<8x128xf32>
    %cst_21 = arith.constant 0.000000e+00 : f32
    %70 = vector.broadcast %cst_21 : f32 to vector<8x9xf32>
    %71 = vector.extract_strided_slice %69 {offsets = [0, 0], sizes = [8, 119], strides = [1, 1]} : vector<8x128xf32> to vector<8x119xf32>
    %72 = tpu.concatenate %70, %71 in 1 : vector<8x9xf32>, vector<8x119xf32> -> vector<8x128xf32>
    %73 = arith.andi %10, %14 : vector<1x128xi1>
    %cst_22 = arith.constant 0.000000e+00 : f32
    %74 = vector.shape_cast %73 : vector<1x128xi1> to vector<1x128xi1>
    %75 = vector.broadcast %74 : vector<1x128xi1> to vector<8x128xi1>
    %76 = vector.broadcast %cst_22 : f32 to vector<8x128xf32>
    %77 = arith.select %75, %72, %76 : vector<8x128xi1>, vector<8x128xf32>
    %cst_23 = arith.constant 0.000000e+00 : f32
    %78 = vector.broadcast %cst_23 : f32 to vector<8x8xf32>
    %79 = vector.extract_strided_slice %69 {offsets = [0, 0], sizes = [8, 120], strides = [1, 1]} : vector<8x128xf32> to vector<8x120xf32>
    %80 = tpu.concatenate %78, %79 in 1 : vector<8x8xf32>, vector<8x120xf32> -> vector<8x128xf32>
    %cst_24 = arith.constant 0.000000e+00 : f32
    %81 = vector.shape_cast %10 : vector<1x128xi1> to vector<1x128xi1>
    %82 = vector.broadcast %81 : vector<1x128xi1> to vector<8x128xi1>
    %83 = vector.broadcast %cst_24 : f32 to vector<8x128xf32>
    %84 = arith.select %82, %80, %83 : vector<8x128xi1>, vector<8x128xf32>
    %cst_25 = arith.constant 0.000000e+00 : f32
    %85 = vector.broadcast %cst_25 : f32 to vector<8x7xf32>
    %86 = vector.extract_strided_slice %69 {offsets = [0, 0], sizes = [8, 121], strides = [1, 1]} : vector<8x128xf32> to vector<8x121xf32>
    %87 = tpu.concatenate %85, %86 in 1 : vector<8x7xf32>, vector<8x121xf32> -> vector<8x128xf32>
    %88 = arith.andi %10, %16 : vector<1x128xi1>
    %cst_26 = arith.constant 0.000000e+00 : f32
    %89 = vector.shape_cast %88 : vector<1x128xi1> to vector<1x128xi1>
    %90 = vector.broadcast %89 : vector<1x128xi1> to vector<8x128xi1>
    %91 = vector.broadcast %cst_26 : f32 to vector<8x128xf32>
    %92 = arith.select %90, %87, %91 : vector<8x128xi1>, vector<8x128xf32>
    %cst_27 = arith.constant 0.000000e+00 : f32
    %93 = vector.broadcast %cst_27 : f32 to vector<8x1xf32>
    %94 = vector.extract_strided_slice %69 {offsets = [0, 0], sizes = [8, 127], strides = [1, 1]} : vector<8x128xf32> to vector<8x127xf32>
    %95 = tpu.concatenate %93, %94 in 1 : vector<8x1xf32>, vector<8x127xf32> -> vector<8x128xf32>
    %cst_28 = arith.constant 0.000000e+00 : f32
    %96 = vector.shape_cast %14 : vector<1x128xi1> to vector<1x128xi1>
    %97 = vector.broadcast %96 : vector<1x128xi1> to vector<8x128xi1>
    %98 = vector.broadcast %cst_28 : f32 to vector<8x128xf32>
    %99 = arith.select %97, %95, %98 : vector<8x128xi1>, vector<8x128xf32>
    %100 = vector.extract_strided_slice %69 {offsets = [0, 1], sizes = [8, 127], strides = [1, 1]} : vector<8x128xf32> to vector<8x127xf32>
    %cst_29 = arith.constant 0.000000e+00 : f32
    %101 = vector.broadcast %cst_29 : f32 to vector<8x1xf32>
    %102 = tpu.concatenate %100, %101 in 1 : vector<8x127xf32>, vector<8x1xf32> -> vector<8x128xf32>
    %cst_30 = arith.constant 0.000000e+00 : f32
    %103 = vector.shape_cast %16 : vector<1x128xi1> to vector<1x128xi1>
    %104 = vector.broadcast %103 : vector<1x128xi1> to vector<8x128xi1>
    %105 = vector.broadcast %cst_30 : f32 to vector<8x128xf32>
    %106 = arith.select %104, %102, %105 : vector<8x128xi1>, vector<8x128xf32>
    %107 = vector.extract_strided_slice %69 {offsets = [0, 7], sizes = [8, 121], strides = [1, 1]} : vector<8x128xf32> to vector<8x121xf32>
    %cst_31 = arith.constant 0.000000e+00 : f32
    %108 = vector.broadcast %cst_31 : f32 to vector<8x7xf32>
    %109 = tpu.concatenate %107, %108 in 1 : vector<8x121xf32>, vector<8x7xf32> -> vector<8x128xf32>
    %110 = arith.andi %12, %14 : vector<1x128xi1>
    %cst_32 = arith.constant 0.000000e+00 : f32
    %111 = vector.shape_cast %110 : vector<1x128xi1> to vector<1x128xi1>
    %112 = vector.broadcast %111 : vector<1x128xi1> to vector<8x128xi1>
    %113 = vector.broadcast %cst_32 : f32 to vector<8x128xf32>
    %114 = arith.select %112, %109, %113 : vector<8x128xi1>, vector<8x128xf32>
    %115 = vector.extract_strided_slice %69 {offsets = [0, 8], sizes = [8, 120], strides = [1, 1]} : vector<8x128xf32> to vector<8x120xf32>
    %cst_33 = arith.constant 0.000000e+00 : f32
    %116 = vector.broadcast %cst_33 : f32 to vector<8x8xf32>
    %117 = tpu.concatenate %115, %116 in 1 : vector<8x120xf32>, vector<8x8xf32> -> vector<8x128xf32>
    %cst_34 = arith.constant 0.000000e+00 : f32
    %118 = vector.shape_cast %12 : vector<1x128xi1> to vector<1x128xi1>
    %119 = vector.broadcast %118 : vector<1x128xi1> to vector<8x128xi1>
    %120 = vector.broadcast %cst_34 : f32 to vector<8x128xf32>
    %121 = arith.select %119, %117, %120 : vector<8x128xi1>, vector<8x128xf32>
    %122 = vector.extract_strided_slice %69 {offsets = [0, 9], sizes = [8, 119], strides = [1, 1]} : vector<8x128xf32> to vector<8x119xf32>
    %cst_35 = arith.constant 0.000000e+00 : f32
    %123 = vector.broadcast %cst_35 : f32 to vector<8x9xf32>
    %124 = tpu.concatenate %122, %123 in 1 : vector<8x119xf32>, vector<8x9xf32> -> vector<8x128xf32>
    %125 = arith.andi %12, %16 : vector<1x128xi1>
    %cst_36 = arith.constant 0.000000e+00 : f32
    %126 = vector.shape_cast %125 : vector<1x128xi1> to vector<1x128xi1>
    %127 = vector.broadcast %126 : vector<1x128xi1> to vector<8x128xi1>
    %128 = vector.broadcast %cst_36 : f32 to vector<8x128xf32>
    %129 = arith.select %127, %124, %128 : vector<8x128xi1>, vector<8x128xf32>
    %130 = tpu.concatenate %77, %84, %92, %99, %69, %106, %114, %121, %129 in 0 : vector<8x128xf32>, vector<8x128xf32>, vector<8x128xf32>, vector<8x128xf32>, vector<8x128xf32>, vector<8x128xf32>, vector<8x128xf32>, vector<8x128xf32>, vector<8x128xf32> -> vector<72x128xf32>
    %c0_37 = arith.constant 0 : index
    %c0_38 = arith.constant 0 : index
    %131 = vector.load %arg4[%c0_37, %c0_38] : memref<8x72xf32, #tpu.memory_space<vmem>>, vector<8x72xf32>
    %cst_39 = arith.constant dense<0.000000e+00> : vector<8x128xf32>
    %132 = tpu.matmul %131, %130, %cst_39 {dimension_numbers = #tpu.dot_dimension_numbers<[1], [0], [0], [1], [0, 0, 1, 1], [], []>, precision = #tpu.contract_precision<fp32>} : vector<8x72xf32>, vector<72x128xf32>, vector<8x128xf32> -> vector<8x128xf32>
    %c0_40 = arith.constant 0 : index
    %c0_41 = arith.constant 0 : index
    %133 = vector.load %arg5[%c0_40, %c0_41] : memref<8x1xf32, #tpu.memory_space<vmem>>, vector<8x1xf32>
    %134 = vector.broadcast %133 : vector<8x1xf32> to vector<8x128xf32>
    %135 = arith.addf %132, %134 : vector<8x128xf32>
    %cst_42 = arith.constant 0.000000e+00 : f32
    %136 = vector.broadcast %cst_42 : f32 to vector<8x128xf32>
    %137 = arith.maximumf %135, %136 : vector<8x128xf32>
    %cst_43 = arith.constant 0.000000e+00 : f32
    %138 = vector.broadcast %cst_43 : f32 to vector<8x9xf32>
    %139 = vector.extract_strided_slice %137 {offsets = [0, 0], sizes = [8, 119], strides = [1, 1]} : vector<8x128xf32> to vector<8x119xf32>
    %140 = tpu.concatenate %138, %139 in 1 : vector<8x9xf32>, vector<8x119xf32> -> vector<8x128xf32>
    %141 = arith.andi %10, %14 : vector<1x128xi1>
    %cst_44 = arith.constant 0.000000e+00 : f32
    %142 = vector.shape_cast %141 : vector<1x128xi1> to vector<1x128xi1>
    %143 = vector.broadcast %142 : vector<1x128xi1> to vector<8x128xi1>
    %144 = vector.broadcast %cst_44 : f32 to vector<8x128xf32>
    %145 = arith.select %143, %140, %144 : vector<8x128xi1>, vector<8x128xf32>
    %cst_45 = arith.constant 0.000000e+00 : f32
    %146 = vector.broadcast %cst_45 : f32 to vector<8x8xf32>
    %147 = vector.extract_strided_slice %137 {offsets = [0, 0], sizes = [8, 120], strides = [1, 1]} : vector<8x128xf32> to vector<8x120xf32>
    %148 = tpu.concatenate %146, %147 in 1 : vector<8x8xf32>, vector<8x120xf32> -> vector<8x128xf32>
    %cst_46 = arith.constant 0.000000e+00 : f32
    %149 = vector.shape_cast %10 : vector<1x128xi1> to vector<1x128xi1>
    %150 = vector.broadcast %149 : vector<1x128xi1> to vector<8x128xi1>
    %151 = vector.broadcast %cst_46 : f32 to vector<8x128xf32>
    %152 = arith.select %150, %148, %151 : vector<8x128xi1>, vector<8x128xf32>
    %cst_47 = arith.constant 0.000000e+00 : f32
    %153 = vector.broadcast %cst_47 : f32 to vector<8x7xf32>
    %154 = vector.extract_strided_slice %137 {offsets = [0, 0], sizes = [8, 121], strides = [1, 1]} : vector<8x128xf32> to vector<8x121xf32>
    %155 = tpu.concatenate %153, %154 in 1 : vector<8x7xf32>, vector<8x121xf32> -> vector<8x128xf32>
    %156 = arith.andi %10, %16 : vector<1x128xi1>
    %cst_48 = arith.constant 0.000000e+00 : f32
    %157 = vector.shape_cast %156 : vector<1x128xi1> to vector<1x128xi1>
    %158 = vector.broadcast %157 : vector<1x128xi1> to vector<8x128xi1>
    %159 = vector.broadcast %cst_48 : f32 to vector<8x128xf32>
    %160 = arith.select %158, %155, %159 : vector<8x128xi1>, vector<8x128xf32>
    %cst_49 = arith.constant 0.000000e+00 : f32
    %161 = vector.broadcast %cst_49 : f32 to vector<8x1xf32>
    %162 = vector.extract_strided_slice %137 {offsets = [0, 0], sizes = [8, 127], strides = [1, 1]} : vector<8x128xf32> to vector<8x127xf32>
    %163 = tpu.concatenate %161, %162 in 1 : vector<8x1xf32>, vector<8x127xf32> -> vector<8x128xf32>
    %cst_50 = arith.constant 0.000000e+00 : f32
    %164 = vector.shape_cast %14 : vector<1x128xi1> to vector<1x128xi1>
    %165 = vector.broadcast %164 : vector<1x128xi1> to vector<8x128xi1>
    %166 = vector.broadcast %cst_50 : f32 to vector<8x128xf32>
    %167 = arith.select %165, %163, %166 : vector<8x128xi1>, vector<8x128xf32>
    %168 = vector.extract_strided_slice %137 {offsets = [0, 1], sizes = [8, 127], strides = [1, 1]} : vector<8x128xf32> to vector<8x127xf32>
    %cst_51 = arith.constant 0.000000e+00 : f32
    %169 = vector.broadcast %cst_51 : f32 to vector<8x1xf32>
    %170 = tpu.concatenate %168, %169 in 1 : vector<8x127xf32>, vector<8x1xf32> -> vector<8x128xf32>
    %cst_52 = arith.constant 0.000000e+00 : f32
    %171 = vector.shape_cast %16 : vector<1x128xi1> to vector<1x128xi1>
    %172 = vector.broadcast %171 : vector<1x128xi1> to vector<8x128xi1>
    %173 = vector.broadcast %cst_52 : f32 to vector<8x128xf32>
    %174 = arith.select %172, %170, %173 : vector<8x128xi1>, vector<8x128xf32>
    %175 = vector.extract_strided_slice %137 {offsets = [0, 7], sizes = [8, 121], strides = [1, 1]} : vector<8x128xf32> to vector<8x121xf32>
    %cst_53 = arith.constant 0.000000e+00 : f32
    %176 = vector.broadcast %cst_53 : f32 to vector<8x7xf32>
    %177 = tpu.concatenate %175, %176 in 1 : vector<8x121xf32>, vector<8x7xf32> -> vector<8x128xf32>
    %178 = arith.andi %12, %14 : vector<1x128xi1>
    %cst_54 = arith.constant 0.000000e+00 : f32
    %179 = vector.shape_cast %178 : vector<1x128xi1> to vector<1x128xi1>
    %180 = vector.broadcast %179 : vector<1x128xi1> to vector<8x128xi1>
    %181 = vector.broadcast %cst_54 : f32 to vector<8x128xf32>
    %182 = arith.select %180, %177, %181 : vector<8x128xi1>, vector<8x128xf32>
    %183 = vector.extract_strided_slice %137 {offsets = [0, 8], sizes = [8, 120], strides = [1, 1]} : vector<8x128xf32> to vector<8x120xf32>
    %cst_55 = arith.constant 0.000000e+00 : f32
    %184 = vector.broadcast %cst_55 : f32 to vector<8x8xf32>
    %185 = tpu.concatenate %183, %184 in 1 : vector<8x120xf32>, vector<8x8xf32> -> vector<8x128xf32>
    %cst_56 = arith.constant 0.000000e+00 : f32
    %186 = vector.shape_cast %12 : vector<1x128xi1> to vector<1x128xi1>
    %187 = vector.broadcast %186 : vector<1x128xi1> to vector<8x128xi1>
    %188 = vector.broadcast %cst_56 : f32 to vector<8x128xf32>
    %189 = arith.select %187, %185, %188 : vector<8x128xi1>, vector<8x128xf32>
    %190 = vector.extract_strided_slice %137 {offsets = [0, 9], sizes = [8, 119], strides = [1, 1]} : vector<8x128xf32> to vector<8x119xf32>
    %cst_57 = arith.constant 0.000000e+00 : f32
    %191 = vector.broadcast %cst_57 : f32 to vector<8x9xf32>
    %192 = tpu.concatenate %190, %191 in 1 : vector<8x119xf32>, vector<8x9xf32> -> vector<8x128xf32>
    %193 = arith.andi %12, %16 : vector<1x128xi1>
    %cst_58 = arith.constant 0.000000e+00 : f32
    %194 = vector.shape_cast %193 : vector<1x128xi1> to vector<1x128xi1>
    %195 = vector.broadcast %194 : vector<1x128xi1> to vector<8x128xi1>
    %196 = vector.broadcast %cst_58 : f32 to vector<8x128xf32>
    %197 = arith.select %195, %192, %196 : vector<8x128xi1>, vector<8x128xf32>
    %198 = tpu.concatenate %145, %152, %160, %167, %137, %174, %182, %189, %197 in 0 : vector<8x128xf32>, vector<8x128xf32>, vector<8x128xf32>, vector<8x128xf32>, vector<8x128xf32>, vector<8x128xf32>, vector<8x128xf32>, vector<8x128xf32>, vector<8x128xf32> -> vector<72x128xf32>
    %c0_59 = arith.constant 0 : index
    %c0_60 = arith.constant 0 : index
    %199 = vector.load %arg6[%c0_59, %c0_60] : memref<8x72xf32, #tpu.memory_space<vmem>>, vector<8x72xf32>
    %cst_61 = arith.constant dense<0.000000e+00> : vector<8x128xf32>
    %200 = tpu.matmul %199, %198, %cst_61 {dimension_numbers = #tpu.dot_dimension_numbers<[1], [0], [0], [1], [0, 0, 1, 1], [], []>, precision = #tpu.contract_precision<fp32>} : vector<8x72xf32>, vector<72x128xf32>, vector<8x128xf32> -> vector<8x128xf32>
    %c0_62 = arith.constant 0 : index
    %c0_63 = arith.constant 0 : index
    %201 = vector.load %arg7[%c0_62, %c0_63] : memref<8x1xf32, #tpu.memory_space<vmem>>, vector<8x1xf32>
    %202 = vector.broadcast %201 : vector<8x1xf32> to vector<8x128xf32>
    %203 = arith.addf %200, %202 : vector<8x128xf32>
    %cst_64 = arith.constant 0.000000e+00 : f32
    %204 = vector.broadcast %cst_64 : f32 to vector<8x128xf32>
    %205 = arith.maximumf %203, %204 : vector<8x128xf32>
    %cst_65 = arith.constant 0.000000e+00 : f32
    %206 = vector.broadcast %cst_65 : f32 to vector<8x9xf32>
    %207 = vector.extract_strided_slice %205 {offsets = [0, 0], sizes = [8, 119], strides = [1, 1]} : vector<8x128xf32> to vector<8x119xf32>
    %208 = tpu.concatenate %206, %207 in 1 : vector<8x9xf32>, vector<8x119xf32> -> vector<8x128xf32>
    %209 = arith.andi %10, %14 : vector<1x128xi1>
    %cst_66 = arith.constant 0.000000e+00 : f32
    %210 = vector.shape_cast %209 : vector<1x128xi1> to vector<1x128xi1>
    %211 = vector.broadcast %210 : vector<1x128xi1> to vector<8x128xi1>
    %212 = vector.broadcast %cst_66 : f32 to vector<8x128xf32>
    %213 = arith.select %211, %208, %212 : vector<8x128xi1>, vector<8x128xf32>
    %cst_67 = arith.constant 0.000000e+00 : f32
    %214 = vector.broadcast %cst_67 : f32 to vector<8x8xf32>
    %215 = vector.extract_strided_slice %205 {offsets = [0, 0], sizes = [8, 120], strides = [1, 1]} : vector<8x128xf32> to vector<8x120xf32>
    %216 = tpu.concatenate %214, %215 in 1 : vector<8x8xf32>, vector<8x120xf32> -> vector<8x128xf32>
    %cst_68 = arith.constant 0.000000e+00 : f32
    %217 = vector.shape_cast %10 : vector<1x128xi1> to vector<1x128xi1>
    %218 = vector.broadcast %217 : vector<1x128xi1> to vector<8x128xi1>
    %219 = vector.broadcast %cst_68 : f32 to vector<8x128xf32>
    %220 = arith.select %218, %216, %219 : vector<8x128xi1>, vector<8x128xf32>
    %cst_69 = arith.constant 0.000000e+00 : f32
    %221 = vector.broadcast %cst_69 : f32 to vector<8x7xf32>
    %222 = vector.extract_strided_slice %205 {offsets = [0, 0], sizes = [8, 121], strides = [1, 1]} : vector<8x128xf32> to vector<8x121xf32>
    %223 = tpu.concatenate %221, %222 in 1 : vector<8x7xf32>, vector<8x121xf32> -> vector<8x128xf32>
    %224 = arith.andi %10, %16 : vector<1x128xi1>
    %cst_70 = arith.constant 0.000000e+00 : f32
    %225 = vector.shape_cast %224 : vector<1x128xi1> to vector<1x128xi1>
    %226 = vector.broadcast %225 : vector<1x128xi1> to vector<8x128xi1>
    %227 = vector.broadcast %cst_70 : f32 to vector<8x128xf32>
    %228 = arith.select %226, %223, %227 : vector<8x128xi1>, vector<8x128xf32>
    %cst_71 = arith.constant 0.000000e+00 : f32
    %229 = vector.broadcast %cst_71 : f32 to vector<8x1xf32>
    %230 = vector.extract_strided_slice %205 {offsets = [0, 0], sizes = [8, 127], strides = [1, 1]} : vector<8x128xf32> to vector<8x127xf32>
    %231 = tpu.concatenate %229, %230 in 1 : vector<8x1xf32>, vector<8x127xf32> -> vector<8x128xf32>
    %cst_72 = arith.constant 0.000000e+00 : f32
    %232 = vector.shape_cast %14 : vector<1x128xi1> to vector<1x128xi1>
    %233 = vector.broadcast %232 : vector<1x128xi1> to vector<8x128xi1>
    %234 = vector.broadcast %cst_72 : f32 to vector<8x128xf32>
    %235 = arith.select %233, %231, %234 : vector<8x128xi1>, vector<8x128xf32>
    %236 = vector.extract_strided_slice %205 {offsets = [0, 1], sizes = [8, 127], strides = [1, 1]} : vector<8x128xf32> to vector<8x127xf32>
    %cst_73 = arith.constant 0.000000e+00 : f32
    %237 = vector.broadcast %cst_73 : f32 to vector<8x1xf32>
    %238 = tpu.concatenate %236, %237 in 1 : vector<8x127xf32>, vector<8x1xf32> -> vector<8x128xf32>
    %cst_74 = arith.constant 0.000000e+00 : f32
    %239 = vector.shape_cast %16 : vector<1x128xi1> to vector<1x128xi1>
    %240 = vector.broadcast %239 : vector<1x128xi1> to vector<8x128xi1>
    %241 = vector.broadcast %cst_74 : f32 to vector<8x128xf32>
    %242 = arith.select %240, %238, %241 : vector<8x128xi1>, vector<8x128xf32>
    %243 = vector.extract_strided_slice %205 {offsets = [0, 7], sizes = [8, 121], strides = [1, 1]} : vector<8x128xf32> to vector<8x121xf32>
    %cst_75 = arith.constant 0.000000e+00 : f32
    %244 = vector.broadcast %cst_75 : f32 to vector<8x7xf32>
    %245 = tpu.concatenate %243, %244 in 1 : vector<8x121xf32>, vector<8x7xf32> -> vector<8x128xf32>
    %246 = arith.andi %12, %14 : vector<1x128xi1>
    %cst_76 = arith.constant 0.000000e+00 : f32
    %247 = vector.shape_cast %246 : vector<1x128xi1> to vector<1x128xi1>
    %248 = vector.broadcast %247 : vector<1x128xi1> to vector<8x128xi1>
    %249 = vector.broadcast %cst_76 : f32 to vector<8x128xf32>
    %250 = arith.select %248, %245, %249 : vector<8x128xi1>, vector<8x128xf32>
    %251 = vector.extract_strided_slice %205 {offsets = [0, 8], sizes = [8, 120], strides = [1, 1]} : vector<8x128xf32> to vector<8x120xf32>
    %cst_77 = arith.constant 0.000000e+00 : f32
    %252 = vector.broadcast %cst_77 : f32 to vector<8x8xf32>
    %253 = tpu.concatenate %251, %252 in 1 : vector<8x120xf32>, vector<8x8xf32> -> vector<8x128xf32>
    %cst_78 = arith.constant 0.000000e+00 : f32
    %254 = vector.shape_cast %12 : vector<1x128xi1> to vector<1x128xi1>
    %255 = vector.broadcast %254 : vector<1x128xi1> to vector<8x128xi1>
    %256 = vector.broadcast %cst_78 : f32 to vector<8x128xf32>
    %257 = arith.select %255, %253, %256 : vector<8x128xi1>, vector<8x128xf32>
    %258 = vector.extract_strided_slice %205 {offsets = [0, 9], sizes = [8, 119], strides = [1, 1]} : vector<8x128xf32> to vector<8x119xf32>
    %cst_79 = arith.constant 0.000000e+00 : f32
    %259 = vector.broadcast %cst_79 : f32 to vector<8x9xf32>
    %260 = tpu.concatenate %258, %259 in 1 : vector<8x119xf32>, vector<8x9xf32> -> vector<8x128xf32>
    %261 = arith.andi %12, %16 : vector<1x128xi1>
    %cst_80 = arith.constant 0.000000e+00 : f32
    %262 = vector.shape_cast %261 : vector<1x128xi1> to vector<1x128xi1>
    %263 = vector.broadcast %262 : vector<1x128xi1> to vector<8x128xi1>
    %264 = vector.broadcast %cst_80 : f32 to vector<8x128xf32>
    %265 = arith.select %263, %260, %264 : vector<8x128xi1>, vector<8x128xf32>
    %266 = tpu.concatenate %213, %220, %228, %235, %205, %242, %250, %257, %265 in 0 : vector<8x128xf32>, vector<8x128xf32>, vector<8x128xf32>, vector<8x128xf32>, vector<8x128xf32>, vector<8x128xf32>, vector<8x128xf32>, vector<8x128xf32>, vector<8x128xf32> -> vector<72x128xf32>
    %c0_81 = arith.constant 0 : index
    %c0_82 = arith.constant 0 : index
    %267 = vector.load %arg8[%c0_81, %c0_82] : memref<8x72xf32, #tpu.memory_space<vmem>>, vector<8x72xf32>
    %cst_83 = arith.constant dense<0.000000e+00> : vector<8x128xf32>
    %268 = tpu.matmul %267, %266, %cst_83 {dimension_numbers = #tpu.dot_dimension_numbers<[1], [0], [0], [1], [0, 0, 1, 1], [], []>, precision = #tpu.contract_precision<fp32>} : vector<8x72xf32>, vector<72x128xf32>, vector<8x128xf32> -> vector<8x128xf32>
    %c0_84 = arith.constant 0 : index
    %c0_85 = arith.constant 0 : index
    %269 = vector.load %arg9[%c0_84, %c0_85] : memref<8x1xf32, #tpu.memory_space<vmem>>, vector<8x1xf32>
    %270 = vector.broadcast %269 : vector<8x1xf32> to vector<8x128xf32>
    %271 = arith.addf %268, %270 : vector<8x128xf32>
    %cst_86 = arith.constant 0.000000e+00 : f32
    %272 = vector.broadcast %cst_86 : f32 to vector<8x128xf32>
    %273 = arith.maximumf %271, %272 : vector<8x128xf32>
    %cst_87 = arith.constant 0.000000e+00 : f32
    %274 = vector.broadcast %cst_87 : f32 to vector<8x9xf32>
    %275 = vector.extract_strided_slice %273 {offsets = [0, 0], sizes = [8, 119], strides = [1, 1]} : vector<8x128xf32> to vector<8x119xf32>
    %276 = tpu.concatenate %274, %275 in 1 : vector<8x9xf32>, vector<8x119xf32> -> vector<8x128xf32>
    %277 = arith.andi %10, %14 : vector<1x128xi1>
    %cst_88 = arith.constant 0.000000e+00 : f32
    %278 = vector.shape_cast %277 : vector<1x128xi1> to vector<1x128xi1>
    %279 = vector.broadcast %278 : vector<1x128xi1> to vector<8x128xi1>
    %280 = vector.broadcast %cst_88 : f32 to vector<8x128xf32>
    %281 = arith.select %279, %276, %280 : vector<8x128xi1>, vector<8x128xf32>
    %cst_89 = arith.constant 0.000000e+00 : f32
    %282 = vector.broadcast %cst_89 : f32 to vector<8x8xf32>
    %283 = vector.extract_strided_slice %273 {offsets = [0, 0], sizes = [8, 120], strides = [1, 1]} : vector<8x128xf32> to vector<8x120xf32>
    %284 = tpu.concatenate %282, %283 in 1 : vector<8x8xf32>, vector<8x120xf32> -> vector<8x128xf32>
    %cst_90 = arith.constant 0.000000e+00 : f32
    %285 = vector.shape_cast %10 : vector<1x128xi1> to vector<1x128xi1>
    %286 = vector.broadcast %285 : vector<1x128xi1> to vector<8x128xi1>
    %287 = vector.broadcast %cst_90 : f32 to vector<8x128xf32>
    %288 = arith.select %286, %284, %287 : vector<8x128xi1>, vector<8x128xf32>
    %cst_91 = arith.constant 0.000000e+00 : f32
    %289 = vector.broadcast %cst_91 : f32 to vector<8x7xf32>
    %290 = vector.extract_strided_slice %273 {offsets = [0, 0], sizes = [8, 121], strides = [1, 1]} : vector<8x128xf32> to vector<8x121xf32>
    %291 = tpu.concatenate %289, %290 in 1 : vector<8x7xf32>, vector<8x121xf32> -> vector<8x128xf32>
    %292 = arith.andi %10, %16 : vector<1x128xi1>
    %cst_92 = arith.constant 0.000000e+00 : f32
    %293 = vector.shape_cast %292 : vector<1x128xi1> to vector<1x128xi1>
    %294 = vector.broadcast %293 : vector<1x128xi1> to vector<8x128xi1>
    %295 = vector.broadcast %cst_92 : f32 to vector<8x128xf32>
    %296 = arith.select %294, %291, %295 : vector<8x128xi1>, vector<8x128xf32>
    %cst_93 = arith.constant 0.000000e+00 : f32
    %297 = vector.broadcast %cst_93 : f32 to vector<8x1xf32>
    %298 = vector.extract_strided_slice %273 {offsets = [0, 0], sizes = [8, 127], strides = [1, 1]} : vector<8x128xf32> to vector<8x127xf32>
    %299 = tpu.concatenate %297, %298 in 1 : vector<8x1xf32>, vector<8x127xf32> -> vector<8x128xf32>
    %cst_94 = arith.constant 0.000000e+00 : f32
    %300 = vector.shape_cast %14 : vector<1x128xi1> to vector<1x128xi1>
    %301 = vector.broadcast %300 : vector<1x128xi1> to vector<8x128xi1>
    %302 = vector.broadcast %cst_94 : f32 to vector<8x128xf32>
    %303 = arith.select %301, %299, %302 : vector<8x128xi1>, vector<8x128xf32>
    %304 = vector.extract_strided_slice %273 {offsets = [0, 1], sizes = [8, 127], strides = [1, 1]} : vector<8x128xf32> to vector<8x127xf32>
    %cst_95 = arith.constant 0.000000e+00 : f32
    %305 = vector.broadcast %cst_95 : f32 to vector<8x1xf32>
    %306 = tpu.concatenate %304, %305 in 1 : vector<8x127xf32>, vector<8x1xf32> -> vector<8x128xf32>
    %cst_96 = arith.constant 0.000000e+00 : f32
    %307 = vector.shape_cast %16 : vector<1x128xi1> to vector<1x128xi1>
    %308 = vector.broadcast %307 : vector<1x128xi1> to vector<8x128xi1>
    %309 = vector.broadcast %cst_96 : f32 to vector<8x128xf32>
    %310 = arith.select %308, %306, %309 : vector<8x128xi1>, vector<8x128xf32>
    %311 = vector.extract_strided_slice %273 {offsets = [0, 7], sizes = [8, 121], strides = [1, 1]} : vector<8x128xf32> to vector<8x121xf32>
    %cst_97 = arith.constant 0.000000e+00 : f32
    %312 = vector.broadcast %cst_97 : f32 to vector<8x7xf32>
    %313 = tpu.concatenate %311, %312 in 1 : vector<8x121xf32>, vector<8x7xf32> -> vector<8x128xf32>
    %314 = arith.andi %12, %14 : vector<1x128xi1>
    %cst_98 = arith.constant 0.000000e+00 : f32
    %315 = vector.shape_cast %314 : vector<1x128xi1> to vector<1x128xi1>
    %316 = vector.broadcast %315 : vector<1x128xi1> to vector<8x128xi1>
    %317 = vector.broadcast %cst_98 : f32 to vector<8x128xf32>
    %318 = arith.select %316, %313, %317 : vector<8x128xi1>, vector<8x128xf32>
    %319 = vector.extract_strided_slice %273 {offsets = [0, 8], sizes = [8, 120], strides = [1, 1]} : vector<8x128xf32> to vector<8x120xf32>
    %cst_99 = arith.constant 0.000000e+00 : f32
    %320 = vector.broadcast %cst_99 : f32 to vector<8x8xf32>
    %321 = tpu.concatenate %319, %320 in 1 : vector<8x120xf32>, vector<8x8xf32> -> vector<8x128xf32>
    %cst_100 = arith.constant 0.000000e+00 : f32
    %322 = vector.shape_cast %12 : vector<1x128xi1> to vector<1x128xi1>
    %323 = vector.broadcast %322 : vector<1x128xi1> to vector<8x128xi1>
    %324 = vector.broadcast %cst_100 : f32 to vector<8x128xf32>
    %325 = arith.select %323, %321, %324 : vector<8x128xi1>, vector<8x128xf32>
    %326 = vector.extract_strided_slice %273 {offsets = [0, 9], sizes = [8, 119], strides = [1, 1]} : vector<8x128xf32> to vector<8x119xf32>
    %cst_101 = arith.constant 0.000000e+00 : f32
    %327 = vector.broadcast %cst_101 : f32 to vector<8x9xf32>
    %328 = tpu.concatenate %326, %327 in 1 : vector<8x119xf32>, vector<8x9xf32> -> vector<8x128xf32>
    %329 = arith.andi %12, %16 : vector<1x128xi1>
    %cst_102 = arith.constant 0.000000e+00 : f32
    %330 = vector.shape_cast %329 : vector<1x128xi1> to vector<1x128xi1>
    %331 = vector.broadcast %330 : vector<1x128xi1> to vector<8x128xi1>
    %332 = vector.broadcast %cst_102 : f32 to vector<8x128xf32>
    %333 = arith.select %331, %328, %332 : vector<8x128xi1>, vector<8x128xf32>
    %334 = tpu.concatenate %281, %288, %296, %303, %273, %310, %318, %325, %333 in 0 : vector<8x128xf32>, vector<8x128xf32>, vector<8x128xf32>, vector<8x128xf32>, vector<8x128xf32>, vector<8x128xf32>, vector<8x128xf32>, vector<8x128xf32>, vector<8x128xf32> -> vector<72x128xf32>
    %c0_103 = arith.constant 0 : index
    %c0_104 = arith.constant 0 : index
    %335 = vector.load %arg10[%c0_103, %c0_104] : memref<4x72xf32, #tpu.memory_space<vmem>>, vector<4x72xf32>
    %cst_105 = arith.constant dense<0.000000e+00> : vector<4x128xf32>
    %336 = tpu.matmul %335, %334, %cst_105 {dimension_numbers = #tpu.dot_dimension_numbers<[1], [0], [0], [1], [0, 0, 1, 1], [], []>, precision = #tpu.contract_precision<fp32>} : vector<4x72xf32>, vector<72x128xf32>, vector<4x128xf32> -> vector<4x128xf32>
    %c0_106 = arith.constant 0 : index
    %c0_107 = arith.constant 0 : index
    %337 = vector.load %arg11[%c0_106, %c0_107] : memref<4x1xf32, #tpu.memory_space<vmem>>, vector<4x1xf32>
    %338 = vector.broadcast %337 : vector<4x1xf32> to vector<4x128xf32>
    %339 = arith.addf %336, %338 : vector<4x128xf32>
    %cst_108 = arith.constant 0.000000e+00 : f32
    %340 = vector.broadcast %cst_108 : f32 to vector<4x128xf32>
    %341 = arith.maximumf %339, %340 : vector<4x128xf32>
    %342 = tpu.concatenate %341, %341, %341, %341 in 0 : vector<4x128xf32>, vector<4x128xf32>, vector<4x128xf32>, vector<4x128xf32> -> vector<16x128xf32>
    %343 = arith.addf %1, %342 : vector<16x128xf32>
    %344 = vector.shape_cast %343 : vector<16x128xf32> to vector<1x16x128xf32>
    %c0_109 = arith.constant 0 : index
    %c0_110 = arith.constant 0 : index
    %c0_111 = arith.constant 0 : index
    %345 = vector.load %arg12[%c0_109, %c0_110, %c0_111] : memref<1x16x128xf32, #tpu.memory_space<vmem>>, vector<1x16x128xf32>
    tpu.vector_store %arg12[%c0_109, %c0_110, %c0_111], %344 {strides = array<i32>} : memref<1x16x128xf32, #tpu.memory_space<vmem>>, vector<1x16x128xf32>,
    return
  }
  func.func @transform_0(%arg0: i32) -> (i32, i32, i32) {
    %c0_i32 = arith.constant 0 : i32
    %c0_i32_0 = arith.constant 0 : i32
    %c0_i32_1 = arith.constant 0 : i32
    return %arg0, %c0_i32, %c0_i32_0 : i32, i32, i32
  }
  func.func @transform_1(%arg0: i32) -> (i32, i32) {
    %c0_i32 = arith.constant 0 : i32
    %c0_i32_0 = arith.constant 0 : i32
    %c0_i32_1 = arith.constant 0 : i32
    return %c0_i32, %c0_i32_0 : i32, i32
  }
  func.func @transform_2(%arg0: i32) -> (i32, i32) {
    %c0_i32 = arith.constant 0 : i32
    %c0_i32_0 = arith.constant 0 : i32
    %c0_i32_1 = arith.constant 0 : i32
    return %c0_i32, %c0_i32_0 : i32, i32
  }
  func.func @transform_3(%arg0: i32) -> (i32, i32) {
    %c0_i32 = arith.constant 0 : i32
    %c0_i32_0 = arith.constant 0 : i32
    %c0_i32_1 = arith.constant 0 : i32
    return %c0_i32, %c0_i32_0 : i32, i32
  }
  func.func @transform_4(%arg0: i32) -> (i32, i32) {
    %c0_i32 = arith.constant 0 : i32
    %c0_i32_0 = arith.constant 0 : i32
    %c0_i32_1 = arith.constant 0 : i32
    return %c0_i32, %c0_i32_0 : i32, i32
  }
  func.func @transform_5(%arg0: i32) -> (i32, i32) {
    %c0_i32 = arith.constant 0 : i32
    %c0_i32_0 = arith.constant 0 : i32
    %c0_i32_1 = arith.constant 0 : i32
    return %c0_i32, %c0_i32_0 : i32, i32
  }
  func.func @transform_6(%arg0: i32) -> (i32, i32) {
    %c0_i32 = arith.constant 0 : i32
    %c0_i32_0 = arith.constant 0 : i32
    %c0_i32_1 = arith.constant 0 : i32
    return %c0_i32, %c0_i32_0 : i32, i32
  }
  func.func @transform_7(%arg0: i32) -> (i32, i32) {
    %c0_i32 = arith.constant 0 : i32
    %c0_i32_0 = arith.constant 0 : i32
    %c0_i32_1 = arith.constant 0 : i32
    return %c0_i32, %c0_i32_0 : i32, i32
  }
  func.func @transform_8(%arg0: i32) -> (i32, i32) {
    %c0_i32 = arith.constant 0 : i32
    %c0_i32_0 = arith.constant 0 : i32
    %c0_i32_1 = arith.constant 0 : i32
    return %c0_i32, %c0_i32_0 : i32, i32
  }
  func.func @transform_9(%arg0: i32) -> (i32, i32) {
    %c0_i32 = arith.constant 0 : i32
    %c0_i32_0 = arith.constant 0 : i32
    %c0_i32_1 = arith.constant 0 : i32
    return %c0_i32, %c0_i32_0 : i32, i32
  }
  func.func @transform_10(%arg0: i32) -> (i32, i32) {
    %c0_i32 = arith.constant 0 : i32
    %c0_i32_0 = arith.constant 0 : i32
    %c0_i32_1 = arith.constant 0 : i32
    return %c0_i32, %c0_i32_0 : i32, i32
  }
  func.func @transform_11(%arg0: i32) -> (i32, i32, i32) {
    %c0_i32 = arith.constant 0 : i32
    %c0_i32_0 = arith.constant 0 : i32
    %c0_i32_1 = arith.constant 0 : i32
    return %arg0, %c0_i32, %c0_i32_0 : i32, i32, i32
  }
}

</mosaic_0001>

<bundles_post_ra>
// kernel: hourglass_forward.1
= control target key start
LH: loop header
LB: loop body
LE: loop exit
PB: predicated region body
PF: predicated region fallthrough
CT: control target
= control target key end

     0   :  { %s4301_s21 = smov 8   ;;  %v4302_v4 = vmov 0.0|0.0   ;;  %s4303_s22 = smov 9   ;;  %vm4305_vm0 = vmmov 0   ;;  %v4306_v5 = vmov 0.0   ;;  %v4307_v6 = vmov 0   ;;  %s5372_s0 = inlined_call_operand.vmem [shape: f32[1,16,128], index: 0, kind: input, shape index: {}]   ;;  %s5373_s2 = inlined_call_operand.vmem [shape: f32[8,1], index: 2, kind: input, shape index: {}]   ;;  %s5374_s1 = inlined_call_operand.vmem [shape: f32[8,36], index: 1, kind: input, shape index: {}]   ;;  %s5375_s4 = inlined_call_operand.vmem [shape: f32[8,1], index: 4, kind: input, shape index: {}]   ;;  %s5376_s3 = inlined_call_operand.vmem [shape: f32[8,72], index: 3, kind: input, shape index: {}]   ;;  %s5377_s6 = inlined_call_operand.vmem [shape: f32[8,1], index: 6, kind: input, shape index: {}]   ;;  %s5378_s5 = inlined_call_operand.vmem [shape: f32[8,72], index: 5, kind: input, shape index: {}]   ;;  %s5379_s8 = inlined_call_operand.vmem [shape: f32[8,1], index: 8, kind: input, shape index: {}]   ;;  %s5380_s7 = inlined_call_operand.vmem [shape: f32[8,72], index: 7, kind: input, shape index: {}]   ;;  %s5381_s10 = inlined_call_operand.vmem [shape: f32[4,1], index: 10, kind: input, shape index: {}]   ;;  %s5382_s9 = inlined_call_operand.vmem [shape: f32[4,72], index: 9, kind: input, shape index: {}]   ;;  %s5383_s11 = inlined_call_operand.vmem [shape: f32[1,16,128], index: 11, kind: output, shape index: {}]  }
   0x1   :  { %v39_v0 = vld [vmem:[%s5372_s0 + $0x8] sm:$0xff]  ;;  %v4379_v1 = vld [vmem:[%s5372_s0] sm:$0xff]  ;;  %3908 = vmatprep.subr.bf16.mxu1 %v4302_v4  ;;  %3914 = vmatprep.subr.bf16.mxu0 %v4302_v4  ;;  %s4304_s23 = smov 1   ;;  %v40_v8 = vlaneseq  ;;  %vm63_vm2 = vcmask 64512   ;;  %vm54_vm4 = vcmask 72704   ;;  %vm5384_vm6 = vcmask 1043456  }
   0x2   :  { %60 = vrot.lane.b32.xlu0 %v39_v0, %s4301_s21  ;;  %v4382_v2 = vrot.slane %v39_v0, 4  ;;  %v74_v3 = vrot.slane %v4379_v1, 4  ;;  %3349 = vmatprep.mubr.msk.f32.mxu0 %vm4305_vm0, %v4306_v5  ;;  %v100_v7 = vld [vmem:[%s5373_s2] sm:$0xff]  ;;  %vm5386_vm7 = vcmask 7168   ;;  %vm106_vm8 = vcmask 293888   ;;  %s4309_s27 = smov 121  }
   0x3   :  { %3336 = vmatprep.mubr.msk.f32.mxu1 %vm4305_vm0, %v4306_v5  ;;  %4297 = vset.pattern.permute.xlu1 %v4307_v6  ;;  %v4401_v9 = vand.u32 127, %v40_v8  ;;  %v99_v21 = vld [vmem:[%s5374_s1] sm:$0xff]  ;;  %v119_v24 = vand.u32 4294901760, %v4379_v1  ;;  %s4308_s1 = smov 7   ;;  %s4310_s28 = smov 127   ;;  %vm677_vm9 = vcmask 588800  }
   0x4   :  { %51 = vrot.lane.b32.xlu1 %v4382_v2, %s4303_s22  ;;  %4298 = vset.pattern.permute.xlu0 %v4307_v6  ;;  %v110_v30 = vsel %vm5384_vm6, %v4382_v2, 0  ;;  %v108_v31 = vsel %vm106_vm8, %v99_v21, 0  ;;  %s4311_s29 = smov 119   ;;  %s4312_s30 = smov 120   ;;  %vm5388_vm11 = vcmask 56320   ;;  %vm5385_vm14 = vcmask 990208  }
   0x5   :  { %v43_v10 = vshra.s32 %v4401_v9, 3  ;;  %v42_v12 = vand.u32 7, %v4401_v9  ;;  %v4444_v37 = vsub.f32 %v4379_v1, %v119_v24  ;;  %v4448_v40 = vand.u32 4294901760, %v110_v30 }
   0x6   :  { %75 = vrot.lane.b32.xlu0 %v74_v3, %s4304_s23  ;;  %v4450_v41 = vand.u32 4294901760, %v108_v31  ;;  %vm5387_vm15 = vcmask 1039360  }
   0x7   :  { %v4404_v11 = vand.u32 7, %v43_v10  ;;  %vm4410_vm3 = vcmp.gt.s32.totalorder %v42_v12, 0  ;;  %v209_v50 = vand.u32 4294901760, %v4444_v37  ;;  %v222_v51 = vsub.f32 %v110_v30, %v4448_v40  ;;  %v670_v30 = vld [vmem:[%s5376_s3] sm:$0xff] }
   0x8   :  { %68 = vrot.lane.b32.xlu1 %v4382_v2, %s4301_s21  ;;  %v183_v46 = vsub.f32 %v108_v31, %v4450_v41  ;;  %vm4537_vm10 = vcmp.lt.s32.totalorder %v42_v12, 7 }
   0x9   :  { %vm45_vm1 = vcmp.gt.s32.totalorder %v4404_v11, 0  ;;  %v210_v59 = vsub.f32 %v4444_v37, %v209_v50  ;;  %v223_v0 = vand.u32 4294901760, %v222_v51  ;;  %vm46_vm13 = vcmp.lt.s32.totalorder %v4404_v11, 7 }
   0xa   :  { %83 = vrot.lane.b32.xlu0 %v4382_v2, %s4304_s23  ;;  %vm4419_vm5 = vmand %vm45_vm1, %vm4410_vm3  ;;  %v184_v52 = vand.u32 4294901760, %v183_v46 }
   0xb   :  { %v211_v3 = vand.u32 4294901760, %v210_v59  ;;  %vm4549_vm12 = vmand %vm45_vm1, %vm4537_vm10 }
   0xc   :  { %103 = vperm.xlu1 %4297, %v100_v7   ;;  %v185_v57 = vsub.f32 %v183_v46, %v184_v52  ;;  %v224_v7 = vsub.f32 %v222_v51, %v223_v0  ;;  %vm4571_vm8 = vmand %vm46_vm13, %vm4410_vm3 }
   0xe   :  { %v186_v1 = vand.u32 4294901760, %v185_v57  ;;  %v225_v10 = vand.u32 4294901760, %v224_v7 }
  0x74   :  { %v61_v14 = vpop.permute.xlu0 %60 }
  0x75   :  { %v64_v15 = vsel %vm63_vm2, 0.0, %v61_v14 }
  0x76   :  { %v67_v17 = vsel %vm45_vm1, %v64_v15, 0.0  ;;  %v52_v18 = vpop.permute.xlu1 %51 }
  0x77   :  { %v89_v19 = vrot.slane %v67_v17, 4  ;;  %v55_v20 = vsel %vm54_vm4, 0.0, %v52_v18 }
  0x78   :  { %v59_v22 = vsel %vm4419_vm5, %v55_v20, 0.0  ;;  %v76_v23 = vpop.permute.xlu0 %75 }
  0x79   :  { %v96_v25 = vsel %vm5384_vm6, %v59_v22, %v89_v19  ;;  %v79_v26 = vsel %vm5386_vm7, 0.0, %v76_v23 }
  0x7a   :  { %v113_v27 = vand.u32 4294901760, %v96_v25  ;;  %v82_v28 = vsel %vm4410_vm3, %v79_v26, 0.0  ;;  %v69_v29 = vpop.permute.xlu1 %68 }
  0x7b   :  { %v92_v32 = vrot.slane %v82_v28, 4  ;;  %v71_v33 = vsel %vm63_vm2, 0.0, %v69_v29 }
  0x7c   :  { %v4439_v34 = vsub.f32 %v96_v25, %v113_v27  ;;  %v72_v35 = vsel %vm45_vm1, %v71_v33, 0.0  ;;  %v84_v36 = vpop.permute.xlu0 %83 }
  0x7d   :  { %v97_v38 = vsel %vm5384_vm6, %v72_v35, %v92_v32  ;;  %v86_v39 = vsel %vm5386_vm7, 0.0, %v84_v36 }
  0x7e   :  { %v116_v42 = vand.u32 4294901760, %v97_v38  ;;  %v87_v43 = vsel %vm4410_vm3, %v86_v39, 0.0  ;;  %v195_v44 = vand.u32 4294901760, %v4439_v34 }
  0x7f   :  { %v98_v45 = vsel %vm5384_vm6, %v87_v43, %v4382_v2  ;;  %vm656_vm6 = vcmask 982016  }
  0x80   :  { %v201_v47 = vsub.f32 %v97_v38, %v116_v42  ;;  %v122_v48 = vand.u32 4294901760, %v98_v45  ;;  %v4458_v49 = vpack.c.bf16 %v116_v42, %v113_v27  ;;  %v196_v55 = vsub.f32 %v4439_v34, %v195_v44  ;;  %v671_v27 = vld [vmem:[%s5375_s4] sm:$0xff] }
  0x81   :  { %v679_v38 = vsel %vm677_vm9, %v670_v30, 0 }
  0x82   :  { %v215_v53 = vsub.f32 %v98_v45, %v122_v48  ;;  %3910 = vmatpush3.bf16.msra.mxu1 %v4458_v49  ;;  %v3912_v54 = vpack.c.bf16 %v122_v48, %v119_v24  ;;  %v202_v56 = vand.u32 4294901760, %v201_v47  ;;  %v197_v61 = vand.u32 4294901760, %v196_v55 }
  0x83   :  { %3911 = vmatprep.subr.bf16.mxu1 %v4302_v4  ;;  %v3921_v14 = vpack.c.bf16 %v201_v47, %v4439_v34 }
  0x84   :  { %v203_v58 = vsub.f32 %v201_v47, %v202_v56  ;;  %v216_v60 = vand.u32 4294901760, %v215_v53  ;;  %v3924_v15 = vpack.c.bf16 %v215_v53, %v4444_v37  ;;  %v3933_v17 = vpack.c.bf16 %v202_v56, %v195_v44 }
  0x85   :  { %v4557_v44 = vand.u32 4294901760, %v679_v38 }
  0x86   :  { %3913 = vmatpush3.bf16.msra.mxu1 %v3912_v54  ;;  %v204_v62 = vand.u32 4294901760, %v203_v58  ;;  %v217_v63 = vsub.f32 %v215_v53, %v216_v60  ;;  %v3936_v18 = vpack.c.bf16 %v216_v60, %v209_v50 }
  0x87   :  { %3334 = vmatprep.subr.mxu1 %v4306_v5  ;;  %v4578_v55 = vsub.f32 %v679_v38, %v4557_v44 }
  0x88   :  { %v3915_v2 = vpack.c.bf16 %v204_v62, %v197_v61  ;;  %v218_v6 = vand.u32 4294901760, %v217_v63 }
  0x8a   :  { %3916 = vmatpush3.bf16.msra.mxu0 %v3915_v2  ;;  %3335 = vmatpush3.msra.mxu1 %v4448_v40  ;;  %v3918_v8 = vpack.c.bf16 %v218_v6, %v211_v3  ;;  %v757_v6 = vand.u32 4294901760, %v4578_v55 }
  0x8b   :  { %3917 = vmatprep.subr.bf16.mxu0 %v4302_v4  ;;  %3337 = vmatmul.mubr.f32.vlgmr.msra.gmra.mrb[0].mxu1 %v186_v1  ;;  %v104_v21 = vpop.permute.xlu1 %103 }
  0x8c   :  { %3944 = vmatprep.subr.bf16.mxu1 %v4302_v4  ;;  %3422 = vmatprep.mubr.msk.f32.mxu1 %vm4305_vm0, %v4306_v5 }
  0x8e   :  { %3919 = vmatpush3.bf16.msra.mxu0 %v3918_v8 }
  0x8f   :  { %3347 = vmatprep.subr.mxu0 %v4306_v5 }
  0x92   :  { %3348 = vmatpush3.msra.mxu0 %v225_v10 }
  0x93   :  { %3920 = vmatprep.subr.bf16.mxu0 %v4302_v4  ;;  %3350 = vmatmul.mubr.f32.vlgmr.msra.gmra.mrb[0].mxu0 %v4450_v41 }
  0x94   :  { %3922 = vmatpush3.bf16.msra.mxu0 %v3921_v14  ;;  %3362 = vmatprep.mubr.msk.f32.mxu0 %vm4305_vm0, %v4306_v5 }
  0x95   :  { %3923 = vmatprep.subr.bf16.mxu0 %v4302_v4 }
  0x98   :  { %3925 = vmatpush3.bf16.msra.mxu0 %v3924_v15 }
  0x99   :  { %3360 = vmatprep.subr.mxu0 %v4306_v5 }
  0x9c   :  { %3361 = vmatpush3.msra.mxu0 %v222_v51 }
  0x9d   :  { %3926 = vmatprep.subr.bf16.mxu0 %v4302_v4  ;;  %3363 = vmatmul.mubr.f32.vlgmr.msra.gmra.mrb[0].mxu0 %v183_v46 }
  0x9e   :  { %3928 = vmatpush3.bf16.msra.mxu0 %v4458_v49  ;;  %3375 = vmatprep.mubr.msk.f32.mxu0 %vm4305_vm0, %v4306_v5 }
  0x9f   :  { %3929 = vmatprep.subr.bf16.mxu0 %v4302_v4 }
  0xa2   :  { %3931 = vmatpush3.bf16.msra.mxu0 %v3912_v54 }
  0xa3   :  { %3373 = vmatprep.subr.mxu0 %v4306_v5 }
  0xa6   :  { %3374 = vmatpush3.msra.mxu0 %v4448_v40 }
  0xa7   :  { %3932 = vmatprep.subr.bf16.mxu0 %v4302_v4  ;;  %3376 = vmatmul.mubr.f32.vlgmr.msra.gmra.mrb[0].mxu0 %v184_v52 }
  0xa8   :  { %3934 = vmatpush3.bf16.msra.mxu0 %v3933_v17  ;;  %3388 = vmatprep.mubr.msk.f32.mxu0 %vm4305_vm0, %v4306_v5 }
  0xa9   :  { %3935 = vmatprep.subr.bf16.mxu0 %v4302_v4 }
  0xac   :  { %3937 = vmatpush3.bf16.msra.mxu0 %v3936_v18 }
  0xad   :  { %3386 = vmatprep.subr.mxu0 %v4306_v5 }
  0xb0   :  { %3387 = vmatpush3.msra.mxu0 %v223_v0 }
  0xb1   :  { %3938 = vmatprep.subr.bf16.mxu0 %v4302_v4  ;;  %3389 = vmatmul.mubr.f32.vlgmr.msra.gmra.mrb[0].mxu0 %v4450_v41 }
  0xb2   :  { %3940 = vmatpush3.bf16.msra.mxu0 %v4458_v49  ;;  %3401 = vmatprep.mubr.msk.f32.mxu0 %vm4305_vm0, %v4306_v5 }
  0xb3   :  { %3941 = vmatprep.subr.bf16.mxu0 %v4302_v4 }
  0xb6   :  { %3943 = vmatpush3.bf16.msra.mxu0 %v3912_v54 }
  0xb7   :  { %3399 = vmatprep.subr.mxu0 %v4306_v5 }
  0xba   :  { %3400 = vmatpush3.msra.mxu0 %v4448_v40 }
  0xbb   :  { %3402 = vmatmul.mubr.f32.vlgmr.msra.gmra.mrb[0].mxu0 %v4450_v41  ;;  %4028 = vmatprep.subr.bf16.mxu0 %v4302_v4 }
  0xbc   :  { %3569 = vmatprep.mubr.msk.f32.mxu0 %vm4305_vm0, %v4306_v5 }
 0x15e   :  { %v188_v19 = vpop.f32.mrb[0].mxu1 }
 0x15f   :  { %v3338_v20 = vpop.f32.mrb[1].mxu1  ;;  %v189_v22 = vadd.f32 %v188_v19, %v104_v21 }
 0x18e   :  { %v606_v23 = vpop.f32.mrb[0].mxu0 }
 0x18f   :  { %v4233_v24 = vadd.f32 %v606_v23, %v189_v22  ;;  %v3403_v25 = vpop.f32.mrb[1].mxu0  ;;  %v758_v23 = vsub.f32 %v4578_v55, %v757_v6 }
 0x191   :  { %v4505_v26 = vmax.f32 %v4233_v24, 0.0 }
 0x193   :  { %617 = vrot.lane.b32.xlu1 %v4505_v26, %s4301_s21  ;;  %612 = vrot.lane.b32.xlu0 %v4505_v26, %s4303_s22  ;;  %v694_v0 = vand.u32 4294901760, %v4505_v26 }
 0x195   :  { %v4626_v24 = vsub.f32 %v4505_v26, %v694_v0 }
 0x197   :  { %631 = vrot.lane.b32.xlu1 %v4505_v26, %s4304_s23  ;;  %622 = vrot.lane.b32.xlu0 %v4505_v26, %s4308_s1 }
 0x19b   :  { %644 = vrot.lane.b32.xlu1 %v4505_v26, %s4309_s27  ;;  %636 = vrot.lane.b32.xlu0 %v4505_v26, %s4310_s28 }
 0x19f   :  { %661 = vrot.lane.b32.xlu1 %v4505_v26, %s4311_s29  ;;  %653 = vrot.lane.b32.xlu0 %v4505_v26, %s4312_s30  ;;  %v759_v26 = vand.u32 4294901760, %v758_v23 }
 0x1a3   :  { %674 = vperm.xlu0 %4298, %v671_v27  }
 0x205   :  { %v618_v28 = vpop.permute.xlu1 %617  ;;  %v613_v29 = vpop.permute.xlu0 %612 }
 0x206   :  { %v620_v31 = vsel %vm63_vm2, 0.0, %v618_v28  ;;  %v615_v32 = vsel %vm54_vm4, 0.0, %v613_v29 }
 0x207   :  { %v621_v33 = vsel %vm45_vm1, %v620_v31, 0.0  ;;  %v616_v34 = vsel %vm4419_vm5, %v615_v32, 0.0 }
 0x208   :  { %v685_v36 = vand.u32 4294901760, %v621_v33  ;;  %v682_v37 = vand.u32 4294901760, %v616_v34 }
 0x209   :  { %v632_v39 = vpop.permute.xlu1 %631  ;;  %v623_v40 = vpop.permute.xlu0 %622 }
 0x20a   :  { %v4542_v41 = vpack.c.bf16 %v685_v36, %v682_v37  ;;  %v634_v42 = vsel %vm5386_vm7, 0.0, %v632_v39  ;;  %v626_v43 = vsel %vm5388_vm11, 0.0, %v623_v40  ;;  %v4559_v45 = vsub.f32 %v621_v33, %v685_v36  ;;  %vm4615_vm7 = vmand %vm46_vm13, %vm4537_vm10 }
 0x20b   :  { %v635_v12 = vsel %vm4410_vm3, %v634_v42, 0.0  ;;  %v4562_v47 = vsub.f32 %v616_v34, %v682_v37  ;;  %v630_v48 = vsel %vm4549_vm12, %v626_v43, 0.0  ;;  %v796_v37 = vand.u32 4294901760, %v4626_v24 }
 0x20c   :  { %v691_v46 = vand.u32 4294901760, %v635_v12  ;;  %3946 = vmatpush3.bf16.msra.mxu1 %v4542_v41  ;;  %v688_v51 = vand.u32 4294901760, %v630_v48  ;;  %v775_v56 = vand.u32 4294901760, %v4559_v45 }
 0x20d   :  { %v645_v49 = vpop.permute.xlu1 %644  ;;  %v637_v50 = vpop.permute.xlu0 %636  ;;  %3947 = vmatprep.subr.bf16.mxu1 %v4302_v4  ;;  %v768_v58 = vand.u32 4294901760, %v4562_v47 }
 0x20e   :  { %v648_v53 = vsel %vm5385_vm14, %v645_v49, 0.0  ;;  %v640_v54 = vsel %vm5387_vm15, %v637_v50, 0.0  ;;  %v4581_v57 = vpack.c.bf16 %v691_v46, %v688_v51  ;;  %v4584_v59 = vsub.f32 %v635_v12, %v691_v46 }
 0x20f   :  { %v643_v60 = vsel %vm4537_vm10, %v640_v54, 0.0  ;;  %v4588_v62 = vsub.f32 %v630_v48, %v688_v51  ;;  %v652_v63 = vsel %vm4571_vm8, %v648_v53, 0.0  ;;  %vm664_vm14 = vcmask 973824  }
 0x210   :  { %v697_v1 = vand.u32 4294901760, %v643_v60  ;;  %3949 = vmatpush3.bf16.msra.mxu1 %v4581_v57  ;;  %v776_v7 = vsub.f32 %v4559_v45, %v775_v56  ;;  %v769_v10 = vsub.f32 %v4562_v47, %v768_v58  ;;  %v789_v14 = vand.u32 4294901760, %v4584_v59 }
 0x211   :  { %v654_v61 = vpop.permute.xlu0 %653  ;;  %v662_v2 = vpop.permute.xlu1 %661  ;;  %3950 = vmatprep.subr.bf16.mxu1 %v4302_v4  ;;  %v700_v15 = vand.u32 4294901760, %v652_v63  ;;  %v782_v18 = vand.u32 4294901760, %v4588_v62  ;;  %v797_v46 = vsub.f32 %v4626_v24, %v796_v37 }
 0x212   :  { %v657_v3 = vsel %vm656_vm6, %v654_v61, 0.0  ;;  %v4600_v8 = vpack.c.bf16 %v697_v1, %v694_v0  ;;  %v4609_v19 = vsub.f32 %v643_v60, %v697_v1  ;;  %v665_v21 = vsel %vm664_vm14, %v662_v2, 0.0 }
 0x213   :  { %v660_v17 = vsel %vm46_vm13, %v657_v3, 0.0  ;;  %v777_v27 = vand.u32 4294901760, %v776_v7  ;;  %v790_v28 = vsub.f32 %v4584_v59, %v789_v14  ;;  %v669_v29 = vsel %vm4615_vm7, %v665_v21, 0.0 }
 0x214   :  { %v703_v22 = vand.u32 4294901760, %v660_v17  ;;  %3952 = vmatpush3.bf16.msra.mxu1 %v4600_v8  ;;  %v770_v30 = vand.u32 4294901760, %v769_v10  ;;  %v783_v31 = vsub.f32 %v4588_v62, %v782_v18  ;;  %v803_v32 = vand.u32 4294901760, %v4609_v19 }
 0x215   :  { %3953 = vmatprep.subr.bf16.mxu1 %v4302_v4  ;;  %v4643_v34 = vsub.f32 %v652_v63, %v700_v15  ;;  %v4645_v36 = vand.u32 4294901760, %v669_v29  ;;  %v791_v38 = vand.u32 4294901760, %v790_v28  ;;  %v798_v54 = vand.u32 4294901760, %v797_v46 }
 0x216   :  { %v4628_v25 = vpack.c.bf16 %v703_v22, %v700_v15  ;;  %v4639_v33 = vsub.f32 %v660_v17, %v703_v22  ;;  %v784_v39 = vand.u32 4294901760, %v783_v31  ;;  %v804_v40 = vsub.f32 %v4609_v19, %v803_v32 }
 0x217   :  { %v3957_v12 = vpack.c.bf16 %v777_v27, %v770_v30  ;;  %v810_v43 = vand.u32 4294901760, %v4643_v34  ;;  %v823_v49 = vsub.f32 %v669_v29, %v4645_v36  ;;  %v3969_v7 = vpack.c.bf16 %v4559_v45, %v4562_v47 }
 0x218   :  { %3955 = vmatpush3.bf16.msra.mxu1 %v4628_v25  ;;  %v817_v42 = vand.u32 4294901760, %v4639_v33  ;;  %v805_v48 = vand.u32 4294901760, %v804_v40  ;;  %v3960_v51 = vpack.c.bf16 %v791_v38, %v784_v39  ;;  %v3972_v10 = vpack.c.bf16 %v4584_v59, %v4588_v62 }
 0x219   :  { %3420 = vmatprep.subr.mxu1 %v4306_v5  ;;  %v811_v53 = vsub.f32 %v4643_v34, %v810_v43  ;;  %v824_v60 = vand.u32 4294901760, %v823_v49  ;;  %v3975_v15 = vpack.c.bf16 %v4609_v19, %v4626_v24  ;;  %v3978_v17 = vpack.c.bf16 %v4639_v33, %v4643_v34 }
 0x21a   :  { %v818_v50 = vsub.f32 %v4639_v33, %v817_v42  ;;  %v3963_v63 = vpack.c.bf16 %v805_v48, %v798_v54  ;;  %v3993_v21 = vpack.c.bf16 %v775_v56, %v768_v58  ;;  %v3996_v22 = vpack.c.bf16 %v789_v14, %v782_v18  ;;  %v1273_v14 = vld [vmem:[%s5378_s5] sm:$0xff] }
 0x21b   :  { %v812_v0 = vand.u32 4294901760, %v811_v53  ;;  %v825_v1 = vsub.f32 %v823_v49, %v824_v60  ;;  %v3999_v45 = vpack.c.bf16 %v803_v32, %v796_v37  ;;  %v4002_v47 = vpack.c.bf16 %v817_v42, %v810_v43 }
 0x21c   :  { %3421 = vmatpush3.msra.mxu1 %v4645_v36  ;;  %v819_v61 = vand.u32 4294901760, %v818_v50  ;;  %v1281_v27 = vsel %vm677_vm9, %v1273_v14, 0 }
 0x21d   :  { %3956 = vmatprep.subr.bf16.mxu1 %v4302_v4  ;;  %3423 = vmatmul.mubr.f32.vlgmr.msra.gmra.mrb[2].mxu1 %v759_v26  ;;  %v826_v3 = vand.u32 4294901760, %v825_v1  ;;  %v4782_v37 = vand.u32 4294901760, %v1281_v27 }
 0x21e   :  { %3958 = vmatpush3.bf16.msra.mxu1 %v3957_v12  ;;  %3443 = vmatprep.mubr.msk.f32.mxu1 %vm4305_vm0, %v4306_v5  ;;  %v3966_v2 = vpack.c.bf16 %v819_v61, %v812_v0 }
 0x21f   :  { %3959 = vmatprep.subr.bf16.mxu1 %v4302_v4 }
 0x222   :  { %3961 = vmatpush3.bf16.msra.mxu1 %v3960_v51  ;;  %v4799_v51 = vsub.f32 %v1281_v27, %v4782_v37 }
 0x223   :  { %3962 = vmatprep.subr.bf16.mxu1 %v4302_v4 }
 0x226   :  { %3964 = vmatpush3.bf16.msra.mxu1 %v3963_v63 }
 0x227   :  { %3965 = vmatprep.subr.bf16.mxu1 %v4302_v4 }
 0x22a   :  { %3967 = vmatpush3.bf16.msra.mxu1 %v3966_v2 }
 0x22b   :  { %3441 = vmatprep.subr.mxu1 %v4306_v5 }
 0x22e   :  { %3442 = vmatpush3.msra.mxu1 %v826_v3 }
 0x22f   :  { %3968 = vmatprep.subr.bf16.mxu1 %v4302_v4  ;;  %3444 = vmatmul.mubr.f32.vlgmr.msra.gmra.mrb[2].mxu1 %v4557_v44 }
 0x230   :  { %3970 = vmatpush3.bf16.msra.mxu1 %v3969_v7  ;;  %3464 = vmatprep.mubr.msk.f32.mxu1 %vm4305_vm0, %v4306_v5 }
 0x231   :  { %3971 = vmatprep.subr.bf16.mxu1 %v4302_v4 }
 0x234   :  { %3973 = vmatpush3.bf16.msra.mxu1 %v3972_v10 }
 0x235   :  { %3974 = vmatprep.subr.bf16.mxu1 %v4302_v4 }
 0x238   :  { %3976 = vmatpush3.bf16.msra.mxu1 %v3975_v15 }
 0x239   :  { %3977 = vmatprep.subr.bf16.mxu1 %v4302_v4 }
 0x23c   :  { %3979 = vmatpush3.bf16.msra.mxu1 %v3978_v17 }
 0x23d   :  { %3462 = vmatprep.subr.mxu1 %v4306_v5 }
 0x240   :  { %3463 = vmatpush3.msra.mxu1 %v823_v49 }
 0x241   :  { %3980 = vmatprep.subr.bf16.mxu1 %v4302_v4  ;;  %3465 = vmatmul.mubr.f32.vlgmr.msra.gmra.mrb[2].mxu1 %v4578_v55 }
 0x242   :  { %3982 = vmatpush3.bf16.msra.mxu1 %v4542_v41  ;;  %3485 = vmatprep.mubr.msk.f32.mxu1 %vm4305_vm0, %v4306_v5 }
 0x243   :  { %3983 = vmatprep.subr.bf16.mxu1 %v4302_v4 }
 0x246   :  { %3985 = vmatpush3.bf16.msra.mxu1 %v4581_v57 }
 0x247   :  { %3986 = vmatprep.subr.bf16.mxu1 %v4302_v4 }
 0x24a   :  { %3988 = vmatpush3.bf16.msra.mxu1 %v4600_v8 }
 0x24b   :  { %3989 = vmatprep.subr.bf16.mxu1 %v4302_v4 }
 0x24e   :  { %3991 = vmatpush3.bf16.msra.mxu1 %v4628_v25 }
 0x24f   :  { %3483 = vmatprep.subr.mxu1 %v4306_v5 }
 0x252   :  { %3484 = vmatpush3.msra.mxu1 %v4645_v36 }
 0x253   :  { %3992 = vmatprep.subr.bf16.mxu1 %v4302_v4  ;;  %3486 = vmatmul.mubr.f32.vlgmr.msra.gmra.mrb[2].mxu1 %v757_v6 }
 0x254   :  { %3994 = vmatpush3.bf16.msra.mxu1 %v3993_v21  ;;  %3506 = vmatprep.mubr.msk.f32.mxu1 %vm4305_vm0, %v4306_v5 }
 0x255   :  { %3995 = vmatprep.subr.bf16.mxu1 %v4302_v4 }
 0x258   :  { %3997 = vmatpush3.bf16.msra.mxu1 %v3996_v22 }
 0x259   :  { %3998 = vmatprep.subr.bf16.mxu1 %v4302_v4 }
 0x25c   :  { %4000 = vmatpush3.bf16.msra.mxu1 %v3999_v45 }
 0x25d   :  { %4001 = vmatprep.subr.bf16.mxu1 %v4302_v4 }
 0x260   :  { %4003 = vmatpush3.bf16.msra.mxu1 %v4002_v47 }
 0x261   :  { %3504 = vmatprep.subr.mxu1 %v4306_v5 }
 0x264   :  { %3505 = vmatpush3.msra.mxu1 %v824_v60 }
 0x265   :  { %4004 = vmatprep.subr.bf16.mxu1 %v4302_v4  ;;  %3507 = vmatmul.mubr.f32.vlgmr.msra.gmra.mrb[2].mxu1 %v4557_v44 }
 0x266   :  { %4006 = vmatpush3.bf16.msra.mxu1 %v4542_v41  ;;  %3527 = vmatprep.mubr.msk.f32.mxu1 %vm4305_vm0, %v4306_v5  ;;  %v675_v41 = vpop.permute.xlu0 %674 }
 0x267   :  { %4007 = vmatprep.subr.bf16.mxu1 %v4302_v4 }
 0x26a   :  { %4009 = vmatpush3.bf16.msra.mxu1 %v4581_v57 }
 0x26b   :  { %4010 = vmatprep.subr.bf16.mxu1 %v4302_v4 }
 0x26e   :  { %4012 = vmatpush3.bf16.msra.mxu1 %v4600_v8 }
 0x26f   :  { %4013 = vmatprep.subr.bf16.mxu1 %v4302_v4 }
 0x272   :  { %4015 = vmatpush3.bf16.msra.mxu1 %v4628_v25 }
 0x273   :  { %3525 = vmatprep.subr.mxu1 %v4306_v5 }
 0x276   :  { %3526 = vmatpush3.msra.mxu1 %v4645_v36 }
 0x277   :  { %3528 = vmatmul.mubr.f32.vlgmr.msra.gmra.mrb[2].mxu1 %v4557_v44  ;;  %4016 = vmatprep.subr.bf16.mxu1 %v4302_v4  ;;  %v1274_v44 = vld [vmem:[%s5377_s6] sm:$0xff] }
 0x278   :  { %3548 = vmatprep.mubr.msk.f32.mxu1 %vm4305_vm0, %v4306_v5 }
 0x34a   :  { %v1227_v55 = vpop.f32.mrb[2].mxu1 }
 0x34b   :  { %v4234_v56 = vadd.f32 %v1227_v55, %v675_v41  ;;  %v3529_v57 = vpop.f32.mrb[3].mxu1 }
 0x34d   :  { %v4742_v58 = vmax.f32 %v4234_v56, 0.0  ;;  %v1359_v56 = vand.u32 4294901760, %v4799_v51 }
 0x34f   :  { %1243 = vrot.lane.b32.xlu0 %v4742_v58, %s4308_s1  ;;  %1233 = vrot.lane.b32.xlu1 %v4742_v58, %s4303_s22  ;;  %v1296_v26 = vand.u32 4294901760, %v4742_v58 }
 0x351   :  { %v4796_v50 = vsub.f32 %v4742_v58, %v1296_v26 }
 0x353   :  { %1253 = vrot.lane.b32.xlu0 %v4742_v58, %s4310_s28  ;;  %1238 = vrot.lane.b32.xlu1 %v4742_v58, %s4301_s21  ;;  %v1398_v22 = vand.u32 4294901760, %v4796_v50 }
 0x357   :  { %1263 = vrot.lane.b32.xlu0 %v4742_v58, %s4312_s30  ;;  %1248 = vrot.lane.b32.xlu1 %v4742_v58, %s4304_s23 }
 0x35b   :  { %1277 = vperm.xlu0 %4298, %v1274_v44   ;;  %1258 = vrot.lane.b32.xlu1 %v4742_v58, %s4309_s27 }
 0x35f   :  { %1268 = vrot.lane.b32.xlu1 %v4742_v58, %s4311_s29 }
 0x3c1   :  { %v1244_v59 = vpop.permute.xlu0 %1243  ;;  %v1234_v62 = vpop.permute.xlu1 %1233 }
 0x3c2   :  { %v1246_v6 = vsel %vm5388_vm11, 0.0, %v1244_v59  ;;  %v1236_v8 = vsel %vm54_vm4, 0.0, %v1234_v62 }
 0x3c3   :  { %v1247_v18 = vsel %vm4549_vm12, %v1246_v6, 0.0  ;;  %v1237_v19 = vsel %vm4419_vm5, %v1236_v8, 0.0 }
 0x3c4   :  { %v1284_v23 = vand.u32 4294901760, %v1237_v19  ;;  %v1290_v28 = vand.u32 4294901760, %v1247_v18 }
 0x3c5   :  { %v1254_v24 = vpop.permute.xlu0 %1253  ;;  %v1239_v25 = vpop.permute.xlu1 %1238 }
 0x3c6   :  { %v4773_v29 = vsub.f32 %v1237_v19, %v1284_v23  ;;  %v1256_v30 = vsel %vm5387_vm15, %v1254_v24, 0.0  ;;  %v1241_v31 = vsel %vm63_vm2, 0.0, %v1239_v25  ;;  %v4785_v42 = vsub.f32 %v1247_v18, %v1290_v28 }
 0x3c7   :  { %v1257_v32 = vsel %vm4537_vm10, %v1256_v30, 0.0  ;;  %v1242_v33 = vsel %vm45_vm1, %v1241_v31, 0.0  ;;  %vm5401_vm15 = vcmask 7168   ;;  %v1399_v30 = vsub.f32 %v4796_v50, %v1398_v22 }
 0x3c8   :  { %v1299_v34 = vand.u32 4294901760, %v1257_v32  ;;  %v1287_v36 = vand.u32 4294901760, %v1242_v33  ;;  %v1370_v38 = vand.u32 4294901760, %v4773_v29  ;;  %v1384_v0 = vand.u32 4294901760, %v4785_v42 }
 0x3c9   :  { %v1264_v39 = vpop.permute.xlu0 %1263  ;;  %v1249_v40 = vpop.permute.xlu1 %1248 }
 0x3ca   :  { %v4787_v12 = vsub.f32 %v1257_v32, %v1299_v34  ;;  %v4789_v43 = vpack.c.bf16 %v1287_v36, %v1284_v23  ;;  %v4791_v46 = vsub.f32 %v1242_v33, %v1287_v36  ;;  %v1266_v48 = vsel %vm656_vm6, %v1264_v39, 0.0 }
 0x3cb   :  { %v1251_v49 = vsel %vm5401_vm15, 0.0, %v1249_v40  ;;  %v1371_v53 = vsub.f32 %v4773_v29, %v1370_v38  ;;  %v1267_v60 = vsel %vm46_vm13, %v1266_v48, 0.0  ;;  %vm5402_vm15 = vcmask 990208  }
 0x3cc   :  { %v1377_v54 = vand.u32 4294901760, %v4791_v46  ;;  %v1252_v61 = vsel %vm4410_vm3, %v1251_v49, 0.0  ;;  %4018 = vmatpush3.bf16.msra.mxu1 %v4789_v43  ;;  %v1305_v1 = vand.u32 4294901760, %v1267_v60  ;;  %v1405_v7 = vand.u32 4294901760, %v4787_v12 }
 0x3cd   :  { %v1259_v63 = vpop.permute.xlu1 %1258  ;;  %v1293_v2 = vand.u32 4294901760, %v1252_v61  ;;  %4019 = vmatprep.subr.bf16.mxu1 %v4302_v4  ;;  %v1372_v45 = vand.u32 4294901760, %v1371_v53  ;;  %v1385_v57 = vsub.f32 %v4785_v42, %v1384_v0  ;;  %v4841_v18 = vpack.c.bf16 %v1299_v34, %v1296_v26 }
 0x3ce   :  { %v1261_v3 = vsel %vm5402_vm15, %v1259_v63, 0.0  ;;  %v1378_v10 = vsub.f32 %v4791_v46, %v1377_v54  ;;  %v4828_v58 = vsub.f32 %v1267_v60, %v1305_v1  ;;  %v1406_v62 = vsub.f32 %v4787_v12, %v1405_v7 }
 0x3cf   :  { %v1262_v15 = vsel %vm4571_vm8, %v1261_v3, 0.0  ;;  %v4819_v17 = vpack.c.bf16 %v1293_v2, %v1290_v28  ;;  %v4821_v21 = vsub.f32 %v1252_v61, %v1293_v2  ;;  %v1386_v25 = vand.u32 4294901760, %v1385_v57 }
 0x3d0   :  { %v1379_v47 = vand.u32 4294901760, %v1378_v10  ;;  %v1302_v41 = vand.u32 4294901760, %v1262_v15  ;;  %v1419_v27 = vand.u32 4294901760, %v4828_v58  ;;  %v1407_v31 = vand.u32 4294901760, %v1406_v62 }
 0x3d1   :  { %v1269_v55 = vpop.permute.xlu1 %1268  ;;  %v1391_v44 = vand.u32 4294901760, %v4821_v21  ;;  %4021 = vmatpush3.bf16.msra.mxu1 %v4819_v17  ;;  %v1360_v32 = vsub.f32 %v4799_v51, %v1359_v56  ;;  %v1400_v40 = vand.u32 4294901760, %v1399_v30  ;;  %v4041_v3 = vpack.c.bf16 %v4791_v46, %v4773_v29 }
 0x3d2   :  { %v1271_v59 = vsel %vm664_vm14, %v1269_v55, 0.0  ;;  %v4836_v6 = vsub.f32 %v1262_v15, %v1302_v41  ;;  %4022 = vmatprep.subr.bf16.mxu1 %v4302_v4  ;;  %v4029_v14 = vpack.c.bf16 %v1379_v47, %v1372_v45  ;;  %v4859_v33 = vpack.c.bf16 %v1305_v1, %v1302_v41 }
 0x3d3   :  { %v1272_v8 = vsel %vm4615_vm7, %v1271_v59, 0.0  ;;  %v1392_v19 = vsub.f32 %v4821_v21, %v1391_v44  ;;  %v1420_v39 = vsub.f32 %v4828_v58, %v1419_v27  ;;  %v1361_v48 = vand.u32 4294901760, %v1360_v32 }
 0x3d4   :  { %v4846_v23 = vand.u32 4294901760, %v1272_v8  ;;  %v1412_v24 = vand.u32 4294901760, %v4836_v6  ;;  %4030 = vmatpush3.bf16.msra.mxu0 %v4029_v14  ;;  %v4035_v60 = vpack.c.bf16 %v1407_v31, %v1400_v40  ;;  %v4044_v10 = vpack.c.bf16 %v4821_v21, %v4785_v42  ;;  %v1875_v21 = vld [vmem:[%s5380_s7] sm:$0xff] }
 0x3d5   :  { %v1393_v28 = vand.u32 4294901760, %v1392_v19  ;;  %4024 = vmatpush3.bf16.msra.mxu1 %v4841_v18  ;;  %4031 = vmatprep.subr.bf16.mxu0 %v4302_v4  ;;  %v1421_v61 = vand.u32 4294901760, %v1420_v39  ;;  %v4047_v15 = vpack.c.bf16 %v4787_v12, %v4796_v50  ;;  %v4050_v45 = vpack.c.bf16 %v4828_v58, %v4836_v6 }
 0x3d6   :  { %4025 = vmatprep.subr.bf16.mxu1 %v4302_v4  ;;  %v1413_v26 = vsub.f32 %v4836_v6, %v1412_v24  ;;  %v4865_v34 = vsub.f32 %v1272_v8, %v4846_v23  ;;  %v4065_v47 = vpack.c.bf16 %v1377_v54, %v1370_v38  ;;  %v4068_v41 = vpack.c.bf16 %v1391_v44, %v1384_v0 }
 0x3d7   :  { %v4032_v36 = vpack.c.bf16 %v1393_v28, %v1386_v25  ;;  %v4071_v29 = vpack.c.bf16 %v1405_v7, %v1398_v22  ;;  %v4074_v38 = vpack.c.bf16 %v1419_v27, %v1412_v24  ;;  %v1883_v59 = vsel %vm677_vm9, %v1875_v21, 0 }
 0x3d8   :  { %v1414_v49 = vand.u32 4294901760, %v1413_v26  ;;  %v1426_v53 = vand.u32 4294901760, %v4865_v34  ;;  %vm5403_vm15 = vcmask 7168  }
 0x3d9   :  { %4027 = vmatpush3.bf16.msra.mxu1 %v4859_v33  ;;  %4033 = vmatpush3.bf16.msra.mxu0 %v4032_v36 }
 0x3da   :  { %3546 = vmatprep.subr.mxu1 %v4306_v5  ;;  %4034 = vmatprep.subr.bf16.mxu0 %v4302_v4  ;;  %v1427_v63 = vsub.f32 %v4865_v34, %v1426_v53  ;;  %v4038_v1 = vpack.c.bf16 %v1421_v61, %v1414_v49 }
 0x3dc   :  { %v1428_v2 = vand.u32 4294901760, %v1427_v63 }
 0x3dd   :  { %3547 = vmatpush3.msra.mxu1 %v4846_v23  ;;  %4036 = vmatpush3.bf16.msra.mxu0 %v4035_v60 }
 0x3de   :  { %3549 = vmatmul.mubr.f32.vlgmr.msra.gmra.mrb[4].mxu1 %v1361_v48  ;;  %4037 = vmatprep.subr.bf16.mxu0 %v4302_v4 }
 0x3df   :  { %4088 = vmatprep.subr.bf16.mxu1 %v4302_v4  ;;  %3674 = vmatprep.mubr.msk.f32.mxu1 %vm4305_vm0, %v4306_v5 }
 0x3e1   :  { %4039 = vmatpush3.bf16.msra.mxu0 %v4038_v1 }
 0x3e2   :  { %3567 = vmatprep.subr.mxu0 %v4306_v5 }
 0x3e5   :  { %3568 = vmatpush3.msra.mxu0 %v1428_v2 }
 0x3e6   :  { %4040 = vmatprep.subr.bf16.mxu0 %v4302_v4  ;;  %3570 = vmatmul.mubr.f32.vlgmr.msra.gmra.mrb[2].mxu0 %v4782_v37 }
 0x3e7   :  { %4042 = vmatpush3.bf16.msra.mxu0 %v4041_v3  ;;  %3590 = vmatprep.mubr.msk.f32.mxu0 %vm4305_vm0, %v4306_v5 }
 0x3e8   :  { %4043 = vmatprep.subr.bf16.mxu0 %v4302_v4 }
 0x3eb   :  { %4045 = vmatpush3.bf16.msra.mxu0 %v4044_v10 }
 0x3ec   :  { %4046 = vmatprep.subr.bf16.mxu0 %v4302_v4 }
 0x3ef   :  { %4048 = vmatpush3.bf16.msra.mxu0 %v4047_v15 }
 0x3f0   :  { %4049 = vmatprep.subr.bf16.mxu0 %v4302_v4 }
 0x3f3   :  { %4051 = vmatpush3.bf16.msra.mxu0 %v4050_v45 }
 0x3f4   :  { %3588 = vmatprep.subr.mxu0 %v4306_v5 }
 0x3f7   :  { %3589 = vmatpush3.msra.mxu0 %v4865_v34 }
 0x3f8   :  { %4052 = vmatprep.subr.bf16.mxu0 %v4302_v4  ;;  %3591 = vmatmul.mubr.f32.vlgmr.msra.gmra.mrb[2].mxu0 %v4799_v51 }
 0x3f9   :  { %4054 = vmatpush3.bf16.msra.mxu0 %v4789_v43  ;;  %3611 = vmatprep.mubr.msk.f32.mxu0 %vm4305_vm0, %v4306_v5 }
 0x3fa   :  { %4055 = vmatprep.subr.bf16.mxu0 %v4302_v4 }
 0x3fd   :  { %4057 = vmatpush3.bf16.msra.mxu0 %v4819_v17 }
 0x3fe   :  { %4058 = vmatprep.subr.bf16.mxu0 %v4302_v4 }
 0x401   :  { %4060 = vmatpush3.bf16.msra.mxu0 %v4841_v18 }
 0x402   :  { %4061 = vmatprep.subr.bf16.mxu0 %v4302_v4 }
 0x405   :  { %4063 = vmatpush3.bf16.msra.mxu0 %v4859_v33 }
 0x406   :  { %3609 = vmatprep.subr.mxu0 %v4306_v5 }
 0x409   :  { %3610 = vmatpush3.msra.mxu0 %v4846_v23 }
 0x40a   :  { %4064 = vmatprep.subr.bf16.mxu0 %v4302_v4  ;;  %3612 = vmatmul.mubr.f32.vlgmr.msra.gmra.mrb[2].mxu0 %v1359_v56 }
 0x40b   :  { %4066 = vmatpush3.bf16.msra.mxu0 %v4065_v47  ;;  %3632 = vmatprep.mubr.msk.f32.mxu0 %vm4305_vm0, %v4306_v5 }
 0x40c   :  { %4067 = vmatprep.subr.bf16.mxu0 %v4302_v4 }
 0x40f   :  { %4069 = vmatpush3.bf16.msra.mxu0 %v4068_v41 }
 0x410   :  { %4070 = vmatprep.subr.bf16.mxu0 %v4302_v4 }
 0x413   :  { %4072 = vmatpush3.bf16.msra.mxu0 %v4071_v29 }
 0x414   :  { %4073 = vmatprep.subr.bf16.mxu0 %v4302_v4 }
 0x417   :  { %4075 = vmatpush3.bf16.msra.mxu0 %v4074_v38 }
 0x418   :  { %3630 = vmatprep.subr.mxu0 %v4306_v5 }
 0x41b   :  { %3631 = vmatpush3.msra.mxu0 %v1426_v53 }
 0x41c   :  { %4076 = vmatprep.subr.bf16.mxu0 %v4302_v4  ;;  %3633 = vmatmul.mubr.f32.vlgmr.msra.gmra.mrb[2].mxu0 %v4782_v37 }
 0x41d   :  { %4078 = vmatpush3.bf16.msra.mxu0 %v4789_v43  ;;  %3653 = vmatprep.mubr.msk.f32.mxu0 %vm4305_vm0, %v4306_v5  ;;  %v1278_v43 = vpop.permute.xlu0 %1277 }
 0x41e   :  { %4079 = vmatprep.subr.bf16.mxu0 %v4302_v4 }
 0x421   :  { %4081 = vmatpush3.bf16.msra.mxu0 %v4819_v17 }
 0x422   :  { %4082 = vmatprep.subr.bf16.mxu0 %v4302_v4 }
 0x425   :  { %4084 = vmatpush3.bf16.msra.mxu0 %v4841_v18 }
 0x426   :  { %4085 = vmatprep.subr.bf16.mxu0 %v4302_v4 }
 0x429   :  { %4087 = vmatpush3.bf16.msra.mxu0 %v4859_v33 }
 0x42a   :  { %3651 = vmatprep.subr.mxu0 %v4306_v5 }
 0x42d   :  { %3652 = vmatpush3.msra.mxu0 %v4846_v23  ;;  %v4990_v23 = vand.u32 4294901760, %v1883_v59 }
 0x42e   :  { %3654 = vmatmul.mubr.f32.vlgmr.msra.gmra.mrb[2].mxu0 %v4782_v37  ;;  %4160 = vmatprep.subr.bf16.mxu0 %v4302_v4  ;;  %v1876_v37 = vld [vmem:[%s5379_s8] sm:$0xff] }
 0x42f   :  { %3800 = vmatprep.mubr.msk.f32.mxu0 %vm4305_vm0, %v4306_v5  ;;  %v5003_v34 = vsub.f32 %v1883_v59, %v4990_v23 }
 0x431   :  { %v1961_v10 = vand.u32 4294901760, %v5003_v34 }
 0x4b1   :  { %v1363_v42 = vpop.f32.mrb[4].mxu1 }
 0x4b2   :  { %v3550_v12 = vpop.f32.mrb[5].mxu1  ;;  %v1364_v46 = vadd.f32 %v1363_v42, %v1278_v43 }
 0x501   :  { %v1829_v50 = vpop.f32.mrb[2].mxu0 }
 0x502   :  { %v4236_v51 = vadd.f32 %v1829_v50, %v1364_v46  ;;  %v3655_v54 = vpop.f32.mrb[3].mxu0  ;;  %v1962_v50 = vsub.f32 %v5003_v34, %v1961_v10 }
 0x504   :  { %v4953_v0 = vmax.f32 %v4236_v51, 0.0 }
 0x506   :  { %1840 = vrot.lane.b32.xlu0 %v4953_v0, %s4301_s21  ;;  %1835 = vrot.lane.b32.xlu1 %v4953_v0, %s4303_s22  ;;  %v1898_v63 = vand.u32 4294901760, %v4953_v0 }
 0x508   :  { %v5043_v51 = vsub.f32 %v4953_v0, %v1898_v63 }
 0x50a   :  { %1850 = vrot.lane.b32.xlu0 %v4953_v0, %s4304_s23  ;;  %1845 = vrot.lane.b32.xlu1 %v4953_v0, %s4308_s1 }
 0x50e   :  { %1860 = vrot.lane.b32.xlu0 %v4953_v0, %s4309_s27  ;;  %1855 = vrot.lane.b32.xlu1 %v4953_v0, %s4310_s28 }
 0x512   :  { %1870 = vrot.lane.b32.xlu0 %v4953_v0, %s4311_s29  ;;  %1865 = vrot.lane.b32.xlu1 %v4953_v0, %s4312_s30  ;;  %v1963_v0 = vand.u32 4294901760, %v1962_v50 }
 0x516   :  { %1879 = vperm.xlu1 %4297, %v1876_v37  }
 0x578   :  { %v1841_v7 = vpop.permute.xlu0 %1840  ;;  %v1836_v17 = vpop.permute.xlu1 %1835 }
 0x579   :  { %v1843_v22 = vsel %vm63_vm2, 0.0, %v1841_v7  ;;  %v1838_v55 = vsel %vm54_vm4, 0.0, %v1836_v17 }
 0x57a   :  { %v1844_v56 = vsel %vm45_vm1, %v1843_v22, 0.0  ;;  %v1839_v57 = vsel %vm4419_vm5, %v1838_v55, 0.0 }
 0x57b   :  { %v1889_v58 = vand.u32 4294901760, %v1844_v56  ;;  %v1886_v44 = vand.u32 4294901760, %v1839_v57 }
 0x57c   :  { %v1851_v62 = vpop.permute.xlu0 %1850  ;;  %v1846_v6 = vpop.permute.xlu1 %1845 }
 0x57d   :  { %v4984_v8 = vpack.c.bf16 %v1889_v58, %v1886_v44  ;;  %v1853_v14 = vsel %vm5403_vm15, 0.0, %v1851_v62  ;;  %v1848_v19 = vsel %vm5388_vm11, 0.0, %v1846_v6  ;;  %v4992_v24 = vsub.f32 %v1844_v56, %v1889_v58 }
 0x57e   :  { %v1854_v18 = vsel %vm4410_vm3, %v1853_v14, 0.0  ;;  %v4995_v27 = vsub.f32 %v1839_v57, %v1886_v44  ;;  %v1849_v28 = vsel %vm4549_vm12, %v1848_v19, 0.0  ;;  %vm5404_vm15 = vcmask 990208  }
 0x57f   :  { %v1895_v25 = vand.u32 4294901760, %v1854_v18  ;;  %4090 = vmatpush3.bf16.msra.mxu1 %v4984_v8  ;;  %v1892_v32 = vand.u32 4294901760, %v1849_v28  ;;  %vm5405_vm11 = vcmask 1039360   ;;  %v1979_v36 = vand.u32 4294901760, %v4992_v24 }
 0x580   :  { %v1861_v30 = vpop.permute.xlu0 %1860  ;;  %v1856_v31 = vpop.permute.xlu1 %1855  ;;  %4091 = vmatprep.subr.bf16.mxu1 %v4302_v4  ;;  %v1972_v40 = vand.u32 4294901760, %v4995_v27  ;;  %v2000_v44 = vand.u32 4294901760, %v5043_v51 }
 0x581   :  { %v1863_v33 = vsel %vm5404_vm15, %v1861_v30, 0.0  ;;  %v1858_v26 = vsel %vm5405_vm11, %v1856_v31, 0.0  ;;  %v5006_v39 = vpack.c.bf16 %v1895_v25, %v1892_v32  ;;  %v5009_v48 = vsub.f32 %v1854_v18, %v1895_v25 }
 0x582   :  { %v1859_v49 = vsel %vm4537_vm10, %v1858_v26, 0.0  ;;  %v5013_v60 = vsub.f32 %v1849_v28, %v1892_v32  ;;  %v1864_v61 = vsel %vm4571_vm8, %v1863_v33, 0.0  ;;  %v1980_v15 = vsub.f32 %v4992_v24, %v1979_v36 }
 0x583   :  { %v1901_v1 = vand.u32 4294901760, %v1859_v49  ;;  %4093 = vmatpush3.bf16.msra.mxu1 %v5006_v39  ;;  %v1973_v47 = vsub.f32 %v4995_v27, %v1972_v40  ;;  %v1993_v41 = vand.u32 4294901760, %v5009_v48  ;;  %v1904_v29 = vand.u32 4294901760, %v1864_v61 }
 0x584   :  { %v1866_v53 = vpop.permute.xlu1 %1865  ;;  %v1871_v2 = vpop.permute.xlu0 %1870  ;;  %4094 = vmatprep.subr.bf16.mxu1 %v4302_v4  ;;  %v1986_v42 = vand.u32 4294901760, %v5013_v60  ;;  %v1981_v37 = vand.u32 4294901760, %v1980_v15  ;;  %v2001_v25 = vsub.f32 %v5043_v51, %v2000_v44  ;;  %v4113_v15 = vpack.c.bf16 %v4992_v24, %v4995_v27 }
 0x585   :  { %v1868_v3 = vsel %vm656_vm6, %v1866_v53, 0.0  ;;  %v5025_v45 = vpack.c.bf16 %v1901_v1, %v1898_v63  ;;  %v5034_v12 = vsub.f32 %v1859_v49, %v1901_v1  ;;  %v1873_v43 = vsel %vm664_vm14, %v1871_v2, 0.0 }
 0x586   :  { %v1869_v38 = vsel %vm46_vm13, %v1868_v3, 0.0  ;;  %v1994_v7 = vsub.f32 %v5009_v48, %v1993_v41  ;;  %v1874_v17 = vsel %vm4615_vm7, %v1873_v43, 0.0  ;;  %v1974_v21 = vand.u32 4294901760, %v1973_v47 }
 0x587   :  { %v1907_v46 = vand.u32 4294901760, %v1869_v38  ;;  %4096 = vmatpush3.bf16.msra.mxu1 %v5025_v45  ;;  %v1987_v22 = vsub.f32 %v5013_v60, %v1986_v42  ;;  %v2007_v55 = vand.u32 4294901760, %v5034_v12  ;;  %v5060_v57 = vsub.f32 %v1864_v61, %v1904_v29 }
 0x588   :  { %4097 = vmatprep.subr.bf16.mxu1 %v4302_v4  ;;  %v5062_v58 = vand.u32 4294901760, %v1874_v17  ;;  %v1995_v59 = vand.u32 4294901760, %v1994_v7  ;;  %v4101_v18 = vpack.c.bf16 %v1981_v37, %v1974_v21  ;;  %v2002_v26 = vand.u32 4294901760, %v2001_v25 }
 0x589   :  { %v5045_v54 = vpack.c.bf16 %v1907_v46, %v1904_v29  ;;  %v5056_v56 = vsub.f32 %v1869_v38, %v1907_v46  ;;  %v1988_v62 = vand.u32 4294901760, %v1987_v22  ;;  %v2008_v6 = vsub.f32 %v5034_v12, %v2007_v55 }
 0x58a   :  { %v2014_v19 = vand.u32 4294901760, %v5060_v57  ;;  %v2027_v30 = vsub.f32 %v1874_v17, %v5062_v58  ;;  %v4116_v47 = vpack.c.bf16 %v5009_v48, %v5013_v60  ;;  %v4119_v29 = vpack.c.bf16 %v5034_v12, %v5043_v51 }
 0x58b   :  { %4099 = vmatpush3.bf16.msra.mxu1 %v5045_v54  ;;  %v2021_v14 = vand.u32 4294901760, %v5056_v56  ;;  %v2009_v28 = vand.u32 4294901760, %v2008_v6  ;;  %v4104_v32 = vpack.c.bf16 %v1995_v59, %v1988_v62  ;;  %v4122_v38 = vpack.c.bf16 %v5056_v56, %v5060_v57 }
 0x58c   :  { %3672 = vmatprep.subr.mxu1 %v4306_v5  ;;  %v2015_v33 = vsub.f32 %v5060_v57, %v2014_v19  ;;  %v2028_v49 = vand.u32 4294901760, %v2027_v30  ;;  %v4137_v43 = vpack.c.bf16 %v1979_v36, %v1972_v40  ;;  %v4140_v46 = vpack.c.bf16 %v1993_v41, %v1986_v42 }
 0x58d   :  { %v2022_v31 = vsub.f32 %v5056_v56, %v2021_v14  ;;  %v4107_v61 = vpack.c.bf16 %v2009_v28, %v2002_v26  ;;  %v4143_v24 = vpack.c.bf16 %v2007_v55, %v2000_v44  ;;  %v4146_v27 = vpack.c.bf16 %v2021_v14, %v2014_v19 }
 0x58e   :  { %v2016_v63 = vand.u32 4294901760, %v2015_v33  ;;  %v2029_v1 = vsub.f32 %v2027_v30, %v2028_v49  ;;  %vm5406_vm11 = vcmask 7168  }
 0x58f   :  { %3673 = vmatpush3.msra.mxu1 %v5062_v58  ;;  %v2023_v53 = vand.u32 4294901760, %v2022_v31 }
 0x590   :  { %4100 = vmatprep.subr.bf16.mxu1 %v4302_v4  ;;  %3675 = vmatmul.mubr.f32.vlgmr.msra.gmra.mrb[6].mxu1 %v1963_v0  ;;  %v2030_v3 = vand.u32 4294901760, %v2029_v1 }
 0x591   :  { %4102 = vmatpush3.bf16.msra.mxu1 %v4101_v18  ;;  %3695 = vmatprep.mubr.msk.f32.mxu1 %vm4305_vm0, %v4306_v5  ;;  %v4110_v2 = vpack.c.bf16 %v2023_v53, %v2016_v63 }
 0x592   :  { %4103 = vmatprep.subr.bf16.mxu1 %v4302_v4 }
 0x595   :  { %4105 = vmatpush3.bf16.msra.mxu1 %v4104_v32 }
 0x596   :  { %4106 = vmatprep.subr.bf16.mxu1 %v4302_v4 }
 0x599   :  { %4108 = vmatpush3.bf16.msra.mxu1 %v4107_v61 }
 0x59a   :  { %4109 = vmatprep.subr.bf16.mxu1 %v4302_v4 }
 0x59d   :  { %4111 = vmatpush3.bf16.msra.mxu1 %v4110_v2 }
 0x59e   :  { %3693 = vmatprep.subr.mxu1 %v4306_v5 }
 0x5a1   :  { %3694 = vmatpush3.msra.mxu1 %v2030_v3 }
 0x5a2   :  { %4112 = vmatprep.subr.bf16.mxu1 %v4302_v4  ;;  %3696 = vmatmul.mubr.f32.vlgmr.msra.gmra.mrb[6].mxu1 %v4990_v23 }
 0x5a3   :  { %4114 = vmatpush3.bf16.msra.mxu1 %v4113_v15  ;;  %3716 = vmatprep.mubr.msk.f32.mxu1 %vm4305_vm0, %v4306_v5 }
 0x5a4   :  { %4115 = vmatprep.subr.bf16.mxu1 %v4302_v4 }
 0x5a7   :  { %4117 = vmatpush3.bf16.msra.mxu1 %v4116_v47 }
 0x5a8   :  { %4118 = vmatprep.subr.bf16.mxu1 %v4302_v4 }
 0x5ab   :  { %4120 = vmatpush3.bf16.msra.mxu1 %v4119_v29 }
 0x5ac   :  { %4121 = vmatprep.subr.bf16.mxu1 %v4302_v4 }
 0x5af   :  { %4123 = vmatpush3.bf16.msra.mxu1 %v4122_v38 }
 0x5b0   :  { %3714 = vmatprep.subr.mxu1 %v4306_v5 }
 0x5b3   :  { %3715 = vmatpush3.msra.mxu1 %v2027_v30 }
 0x5b4   :  { %4124 = vmatprep.subr.bf16.mxu1 %v4302_v4  ;;  %3717 = vmatmul.mubr.f32.vlgmr.msra.gmra.mrb[6].mxu1 %v5003_v34 }
 0x5b5   :  { %4126 = vmatpush3.bf16.msra.mxu1 %v4984_v8  ;;  %3737 = vmatprep.mubr.msk.f32.mxu1 %vm4305_vm0, %v4306_v5 }
 0x5b6   :  { %4127 = vmatprep.subr.bf16.mxu1 %v4302_v4 }
 0x5b9   :  { %4129 = vmatpush3.bf16.msra.mxu1 %v5006_v39 }
 0x5ba   :  { %4130 = vmatprep.subr.bf16.mxu1 %v4302_v4 }
 0x5bd   :  { %4132 = vmatpush3.bf16.msra.mxu1 %v5025_v45 }
 0x5be   :  { %4133 = vmatprep.subr.bf16.mxu1 %v4302_v4 }
 0x5c1   :  { %4135 = vmatpush3.bf16.msra.mxu1 %v5045_v54 }
 0x5c2   :  { %3735 = vmatprep.subr.mxu1 %v4306_v5 }
 0x5c5   :  { %3736 = vmatpush3.msra.mxu1 %v5062_v58 }
 0x5c6   :  { %4136 = vmatprep.subr.bf16.mxu1 %v4302_v4  ;;  %3738 = vmatmul.mubr.f32.vlgmr.msra.gmra.mrb[6].mxu1 %v1961_v10  ;;  %v2477_v10 = vld [vmem:[%s5382_s9] sm:$0xf] }
 0x5c7   :  { %4138 = vmatpush3.bf16.msra.mxu1 %v4137_v43  ;;  %3758 = vmatprep.mubr.msk.f32.mxu1 %vm4305_vm0, %v4306_v5 }
 0x5c8   :  { %4139 = vmatprep.subr.bf16.mxu1 %v4302_v4 }
 0x5cb   :  { %4141 = vmatpush3.bf16.msra.mxu1 %v4140_v46 }
 0x5cc   :  { %4142 = vmatprep.subr.bf16.mxu1 %v4302_v4 }
 0x5cf   :  { %4144 = vmatpush3.bf16.msra.mxu1 %v4143_v24 }
 0x5d0   :  { %4145 = vmatprep.subr.bf16.mxu1 %v4302_v4 }
 0x5d3   :  { %4147 = vmatpush3.bf16.msra.mxu1 %v4146_v27 }
 0x5d4   :  { %3756 = vmatprep.subr.mxu1 %v4306_v5 }
 0x5d7   :  { %3757 = vmatpush3.msra.mxu1 %v2028_v49 }
 0x5d8   :  { %4148 = vmatprep.subr.bf16.mxu1 %v4302_v4  ;;  %3759 = vmatmul.mubr.f32.vlgmr.msra.gmra.mrb[6].mxu1 %v4990_v23 }
 0x5d9   :  { %4150 = vmatpush3.bf16.msra.mxu1 %v4984_v8  ;;  %3779 = vmatprep.mubr.msk.f32.mxu1 %vm4305_vm0, %v4306_v5  ;;  %v1880_v8 = vpop.permute.xlu1 %1879 }
 0x5da   :  { %4151 = vmatprep.subr.bf16.mxu1 %v4302_v4 }
 0x5dd   :  { %4153 = vmatpush3.bf16.msra.mxu1 %v5006_v39 }
 0x5de   :  { %4154 = vmatprep.subr.bf16.mxu1 %v4302_v4 }
 0x5e1   :  { %4156 = vmatpush3.bf16.msra.mxu1 %v5025_v45 }
 0x5e2   :  { %4157 = vmatprep.subr.bf16.mxu1 %v4302_v4 }
 0x5e5   :  { %4159 = vmatpush3.bf16.msra.mxu1 %v5045_v54  ;;  %v2485_v54 = vsel %vm677_vm9, %v2477_v10, 0 }
 0x5e6   :  { %3777 = vmatprep.subr.mxu1 %v4306_v5  ;;  %v5193_v56 = vand.u32 4294901760, %v2485_v54 }
 0x5e8   :  { %v5206_v14 = vsub.f32 %v2485_v54, %v5193_v56 }
 0x5e9   :  { %3778 = vmatpush3.msra.mxu1 %v5062_v58 }
 0x5ea   :  { %3780 = vmatmul.mubr.f32.vlgmr.msra.gmra.mrb[6].mxu1 %v4990_v23  ;;  %v2478_v23 = vld [vmem:[%s5381_s10] sm:$0xf]  ;;  %v2563_v61 = vand.u32 4294901760, %v5206_v14 }
 0x5ec   :  { %v2564_v43 = vsub.f32 %v5206_v14, %v2563_v61 }
 0x6bd   :  { %v2431_v34 = vpop.f32.mrb[6].mxu1 }
 0x6be   :  { %v4237_v36 = vadd.f32 %v2431_v34, %v1880_v8  ;;  %v3781_v40 = vpop.f32.mrb[7].mxu1 }
 0x6c0   :  { %v5156_v48 = vmax.f32 %v4237_v36, 0.0 }
 0x6c2   :  { %2442 = vrot.lane.b32.xlu1 %v5156_v48, %s4301_s21  ;;  %2437 = vrot.lane.b32.xlu0 %v5156_v48, %s4303_s22  ;;  %v2500_v33 = vand.u32 4294901760, %v5156_v48 }
 0x6c4   :  { %v5246_v46 = vsub.f32 %v5156_v48, %v2500_v33 }
 0x6c6   :  { %2452 = vrot.lane.b32.xlu1 %v5156_v48, %s4304_s23  ;;  %2447 = vrot.lane.b32.xlu0 %v5156_v48, %s4308_s1  ;;  %v2602_v20 = vand.u32 4294901760, %v5246_v46 }
 0x6ca   :  { %2462 = vrot.lane.b32.xlu1 %v5156_v48, %s4309_s27  ;;  %2457 = vrot.lane.b32.xlu0 %v5156_v48, %s4310_s28 }
 0x6ce   :  { %2472 = vrot.lane.b32.xlu1 %v5156_v48, %s4311_s29  ;;  %2467 = vrot.lane.b32.xlu0 %v5156_v48, %s4312_s30  ;;  %v2565_v48 = vand.u32 4294901760, %v2564_v43 }
 0x6d2   :  { %2481 = vperm.xlu0 %4298, %v2478_v23  }
 0x734   :  { %v2443_v39 = vpop.permute.xlu1 %2442  ;;  %v2438_v60 = vpop.permute.xlu0 %2437 }
 0x735   :  { %v2445_v45 = vsel %vm63_vm2, 0.0, %v2443_v39  ;;  %v2440_v41 = vsel %vm54_vm4, 0.0, %v2438_v60  ;;  %vm5407_vm2 = vcmask 56320  }
 0x736   :  { %v2446_v42 = vsel %vm45_vm1, %v2445_v45, 0.0  ;;  %v2441_v12 = vsel %vm4419_vm5, %v2440_v41, 0.0  ;;  %vm5408_vm1 = vmmov %vm5404_vm15 }
 0x737   :  { %v2491_v50 = vand.u32 4294901760, %v2446_v42  ;;  %v2488_v51 = vand.u32 4294901760, %v2441_v12 }
 0x738   :  { %v2453_v37 = vpop.permute.xlu1 %2452  ;;  %v2448_v7 = vpop.permute.xlu0 %2447 }
 0x739   :  { %v5187_v17 = vpack.c.bf16 %v2491_v50, %v2488_v51  ;;  %v2455_v21 = vsel %vm5406_vm11, 0.0, %v2453_v37  ;;  %v2450_v55 = vsel %vm5407_vm2, 0.0, %v2448_v7  ;;  %v5195_v0 = vsub.f32 %v2446_v42, %v2491_v50 }
 0x73a   :  { %v2456_v22 = vsel %vm4410_vm3, %v2455_v21, 0.0  ;;  %v5198_v57 = vsub.f32 %v2441_v12, %v2488_v51  ;;  %v2451_v58 = vsel %vm4549_vm12, %v2450_v55, 0.0  ;;  %vm5409_vm3 = vcmask 1039360  }
 0x73b   :  { %v2497_v16 = vand.u32 4294901760, %v2456_v22  ;;  %4162 = vmatpush3.bf16.msra.mxu0 %v5187_v17  ;;  %v2494_v13 = vand.u32 4294901760, %v2451_v58  ;;  %v2581_v18 = vand.u32 4294901760, %v5195_v0  ;;  %v2603_v51 = vsub.f32 %v5246_v46, %v2602_v20 }
 0x73c   :  { %v2463_v44 = vpop.permute.xlu1 %2462  ;;  %v2458_v59 = vpop.permute.xlu0 %2457  ;;  %4163 = vmatprep.subr.bf16.mxu0 %v4302_v4  ;;  %v2574_v25 = vand.u32 4294901760, %v5198_v57 }
 0x73d   :  { %v2465_v62 = vsel %vm5408_vm1, %v2463_v44, 0.0  ;;  %v2460_v6 = vsel %vm5409_vm3, %v2458_v59, 0.0  ;;  %v5209_v19 = vpack.c.bf16 %v2497_v16, %v2494_v13  ;;  %v5212_v9 = vsub.f32 %v2456_v22, %v2497_v16 }
 0x73e   :  { %v2461_v28 = vsel %vm4537_vm10, %v2460_v6, 0.0  ;;  %v5216_v31 = vsub.f32 %v2451_v58, %v2494_v13  ;;  %v2466_v32 = vsel %vm4571_vm8, %v2465_v62, 0.0  ;;  %v2582_v35 = vsub.f32 %v5195_v0, %v2581_v18 }
 0x73f   :  { %v2503_v26 = vand.u32 4294901760, %v2461_v28  ;;  %4165 = vmatpush3.bf16.msra.mxu0 %v5209_v19  ;;  %v2575_v52 = vsub.f32 %v5198_v57, %v2574_v25  ;;  %v2595_v1 = vand.u32 4294901760, %v5212_v9  ;;  %v2506_v2 = vand.u32 4294901760, %v2466_v32 }
 0x740   :  { %v2468_v30 = vpop.permute.xlu0 %2467  ;;  %v2473_v49 = vpop.permute.xlu1 %2472  ;;  %4166 = vmatprep.subr.bf16.mxu0 %v4302_v4  ;;  %v2588_v15 = vand.u32 4294901760, %v5216_v31  ;;  %v2583_v24 = vand.u32 4294901760, %v2582_v35  ;;  %v2604_v55 = vand.u32 4294901760, %v2603_v51 }
 0x741   :  { %v2470_v53 = vsel %vm656_vm6, %v2468_v30, 0.0  ;;  %v5228_v63 = vpack.c.bf16 %v2503_v26, %v2500_v33  ;;  %v5237_v47 = vsub.f32 %v2461_v28, %v2503_v26  ;;  %v2475_v29 = vsel %vm664_vm14, %v2473_v49, 0.0 }
 0x742   :  { %v2471_v3 = vsel %vm46_vm13, %v2470_v53, 0.0  ;;  %v2596_v27 = vsub.f32 %v5212_v9, %v2595_v1  ;;  %v2476_v8 = vsel %vm4615_vm7, %v2475_v29, 0.0  ;;  %v2576_v34 = vand.u32 4294901760, %v2575_v52 }
 0x743   :  { %v2509_v38 = vand.u32 4294901760, %v2471_v3  ;;  %4168 = vmatpush3.bf16.msra.mxu0 %v5228_v63  ;;  %v2589_v36 = vsub.f32 %v5216_v31, %v2588_v15  ;;  %v2609_v40 = vand.u32 4294901760, %v5237_v47  ;;  %v5263_v39 = vsub.f32 %v2466_v32, %v2506_v2 }
 0x744   :  { %4169 = vmatprep.subr.bf16.mxu0 %v4302_v4  ;;  %v5265_v60 = vand.u32 4294901760, %v2476_v8  ;;  %v2597_v10 = vand.u32 4294901760, %v2596_v27  ;;  %v4173_v12 = vpack.c.bf16 %v2583_v24, %v2576_v34  ;;  %v4185_v28 = vpack.c.bf16 %v5195_v0, %v5198_v57 }
 0x745   :  { %v5248_v11 = vpack.c.bf16 %v2509_v38, %v2506_v2  ;;  %v5259_v23 = vsub.f32 %v2471_v3, %v2509_v38  ;;  %v2590_v45 = vand.u32 4294901760, %v2589_v36  ;;  %v2610_v41 = vsub.f32 %v5237_v47, %v2609_v40 }
 0x746   :  { %v2616_v50 = vand.u32 4294901760, %v5263_v39  ;;  %v2629_v37 = vsub.f32 %v2476_v8, %v5265_v60  ;;  %v4188_v30 = vpack.c.bf16 %v5212_v9, %v5216_v31  ;;  %v4191_v32 = vpack.c.bf16 %v5237_v47, %v5246_v46 }
 0x747   :  { %4171 = vmatpush3.bf16.msra.mxu0 %v5248_v11  ;;  %v2623_v42 = vand.u32 4294901760, %v5259_v23  ;;  %v2611_v54 = vand.u32 4294901760, %v2610_v41  ;;  %v4176_v21 = vpack.c.bf16 %v2597_v10, %v2590_v45  ;;  %v4194_v33 = vpack.c.bf16 %v5259_v23, %v5263_v39 }
 0x748   :  { %3798 = vmatprep.subr.mxu0 %v4306_v5  ;;  %v2617_v22 = vsub.f32 %v5263_v39, %v2616_v50  ;;  %v2630_v16 = vand.u32 4294901760, %v2629_v37  ;;  %v4209_v26 = vpack.c.bf16 %v2581_v18, %v2574_v25  ;;  %v4212_v49 = vpack.c.bf16 %v2595_v1, %v2588_v15 }
 0x749   :  { %v2624_v7 = vsub.f32 %v5259_v23, %v2623_v42  ;;  %v4179_v44 = vpack.c.bf16 %v2611_v54, %v2604_v55  ;;  %v4215_v0 = vpack.c.bf16 %v2609_v40, %v2602_v20  ;;  %v4218_v57 = vpack.c.bf16 %v2623_v42, %v2616_v50 }
 0x74a   :  { %v2618_v59 = vand.u32 4294901760, %v2617_v22  ;;  %v2631_v13 = vsub.f32 %v2629_v37, %v2630_v16 }
 0x74b   :  { %3799 = vmatpush3.msra.mxu0 %v5265_v60  ;;  %v2625_v58 = vand.u32 4294901760, %v2624_v7 }
 0x74c   :  { %4172 = vmatprep.subr.bf16.mxu0 %v4302_v4  ;;  %3801 = vmatmul.mubr.f32.vlgmr.msra.gmra.mrb[4].mxu0 %v2565_v48  ;;  %v2632_v6 = vand.u32 4294901760, %v2631_v13 }
 0x74d   :  { %4174 = vmatpush3.bf16.msra.mxu0 %v4173_v12  ;;  %3821 = vmatprep.mubr.msk.f32.mxu0 %vm4305_vm0, %v4306_v5  ;;  %v4182_v62 = vpack.c.bf16 %v2625_v58, %v2618_v59 }
 0x74e   :  { %4175 = vmatprep.subr.bf16.mxu0 %v4302_v4 }
 0x751   :  { %4177 = vmatpush3.bf16.msra.mxu0 %v4176_v21 }
 0x752   :  { %4178 = vmatprep.subr.bf16.mxu0 %v4302_v4 }
 0x755   :  { %4180 = vmatpush3.bf16.msra.mxu0 %v4179_v44 }
 0x756   :  { %4181 = vmatprep.subr.bf16.mxu0 %v4302_v4 }
 0x759   :  { %4183 = vmatpush3.bf16.msra.mxu0 %v4182_v62 }
 0x75a   :  { %3819 = vmatprep.subr.mxu0 %v4306_v5 }
 0x75d   :  { %3820 = vmatpush3.msra.mxu0 %v2632_v6 }
 0x75e   :  { %4184 = vmatprep.subr.bf16.mxu0 %v4302_v4  ;;  %3822 = vmatmul.mubr.f32.vlgmr.msra.gmra.mrb[4].mxu0 %v5193_v56 }
 0x75f   :  { %4186 = vmatpush3.bf16.msra.mxu0 %v4185_v28  ;;  %3842 = vmatprep.mubr.msk.f32.mxu0 %vm4305_vm0, %v4306_v5 }
 0x760   :  { %4187 = vmatprep.subr.bf16.mxu0 %v4302_v4 }
 0x763   :  { %4189 = vmatpush3.bf16.msra.mxu0 %v4188_v30 }
 0x764   :  { %4190 = vmatprep.subr.bf16.mxu0 %v4302_v4 }
 0x767   :  { %4192 = vmatpush3.bf16.msra.mxu0 %v4191_v32 }
 0x768   :  { %4193 = vmatprep.subr.bf16.mxu0 %v4302_v4 }
 0x76b   :  { %4195 = vmatpush3.bf16.msra.mxu0 %v4194_v33 }
 0x76c   :  { %3840 = vmatprep.subr.mxu0 %v4306_v5 }
 0x76f   :  { %3841 = vmatpush3.msra.mxu0 %v2629_v37 }
 0x770   :  { %4196 = vmatprep.subr.bf16.mxu0 %v4302_v4  ;;  %3843 = vmatmul.mubr.f32.vlgmr.msra.gmra.mrb[4].mxu0 %v5206_v14 }
 0x771   :  { %4198 = vmatpush3.bf16.msra.mxu0 %v5187_v17  ;;  %3863 = vmatprep.mubr.msk.f32.mxu0 %vm4305_vm0, %v4306_v5 }
 0x772   :  { %4199 = vmatprep.subr.bf16.mxu0 %v4302_v4 }
 0x775   :  { %4201 = vmatpush3.bf16.msra.mxu0 %v5209_v19 }
 0x776   :  { %4202 = vmatprep.subr.bf16.mxu0 %v4302_v4 }
 0x779   :  { %4204 = vmatpush3.bf16.msra.mxu0 %v5228_v63 }
 0x77a   :  { %4205 = vmatprep.subr.bf16.mxu0 %v4302_v4 }
 0x77d   :  { %4207 = vmatpush3.bf16.msra.mxu0 %v5248_v11 }
 0x77e   :  { %3861 = vmatprep.subr.mxu0 %v4306_v5 }
 0x781   :  { %3862 = vmatpush3.msra.mxu0 %v5265_v60 }
 0x782   :  { %4208 = vmatprep.subr.bf16.mxu0 %v4302_v4  ;;  %3864 = vmatmul.mubr.f32.vlgmr.msra.gmra.mrb[4].mxu0 %v2563_v61 }
 0x783   :  { %4210 = vmatpush3.bf16.msra.mxu0 %v4209_v26  ;;  %3884 = vmatprep.mubr.msk.f32.mxu0 %vm4305_vm0, %v4306_v5 }
 0x784   :  { %4211 = vmatprep.subr.bf16.mxu0 %v4302_v4 }
 0x787   :  { %4213 = vmatpush3.bf16.msra.mxu0 %v4212_v49 }
 0x788   :  { %4214 = vmatprep.subr.bf16.mxu0 %v4302_v4 }
 0x78b   :  { %4216 = vmatpush3.bf16.msra.mxu0 %v4215_v0 }
 0x78c   :  { %4217 = vmatprep.subr.bf16.mxu0 %v4302_v4 }
 0x78f   :  { %4219 = vmatpush3.bf16.msra.mxu0 %v4218_v57 }
 0x790   :  { %3882 = vmatprep.subr.mxu0 %v4306_v5 }
 0x793   :  { %3883 = vmatpush3.msra.mxu0 %v2630_v16 }
 0x794   :  { %4220 = vmatprep.subr.bf16.mxu0 %v4302_v4  ;;  %3885 = vmatmul.mubr.f32.vlgmr.msra.gmra.mrb[4].mxu0 %v5193_v56 }
 0x795   :  { %4222 = vmatpush3.bf16.msra.mxu0 %v5187_v17  ;;  %3905 = vmatprep.mubr.msk.f32.mxu0 %vm4305_vm0, %v4306_v5  ;;  %v2482_v17 = vpop.permute.xlu0 %2481  ;;  %vm5410_vm0 = vcmask 1043456  }
 0x796   :  { %4223 = vmatprep.subr.bf16.mxu0 %v4302_v4 }
 0x799   :  { %4225 = vmatpush3.bf16.msra.mxu0 %v5209_v19 }
 0x79a   :  { %4226 = vmatprep.subr.bf16.mxu0 %v4302_v4 }
 0x79d   :  { %4228 = vmatpush3.bf16.msra.mxu0 %v5228_v63 }
 0x79e   :  { %4229 = vmatprep.subr.bf16.mxu0 %v4302_v4  ;;  %v4299_v4 = vld [vmem:[%s5372_s0] sm:$0xff] }
 0x7a1   :  { %4231 = vmatpush3.bf16.msra.mxu0 %v5248_v11 }
 0x7a2   :  { %3903 = vmatprep.subr.mxu0 %v4306_v5  ;;  %v4300_v5 = vld [vmem:[%s5372_s0 + $0x8] sm:$0xff] }
 0x7a5   :  { %3904 = vmatpush3.msra.mxu0 %v5265_v60 }
 0x7a6   :  { %3906 = vmatmul.mubr.f32.vlgmr.msra.gmra.mrb[4].mxu0 %v5193_v56 }
 0x879   :  { %v3033_v14 = vpop.f32.mrb[4].mxu0 }
 0x87a   :  { %v4238_v18 = vadd.f32 %v3033_v14, %v2482_v17  ;;  %v3907_v25 = vpop.f32.mrb[5].mxu0 }
 0x87c   :  { %v3037_v9 = vmax.f32 %v4238_v18, 0.0 }
 0x87e   :  { %v3039_v19 = vrot.slane %v3037_v9, 4 }
 0x880   :  { %v3041_v31 = vsel %vm5410_vm0, %v3037_v9, %v3039_v19 }
 0x881   :  { %v3042_v53 = vadd.f32 %v4299_v4, %v3041_v31  ;;  %v3043_v61 = vadd.f32 %v4300_v5, %v3041_v31 }
 0x883   :  { %3044 = vst [vmem:[%s5383_s11] sm:$0xff] %v3042_v53  ;;  %3045 = vst [vmem:[%s5383_s11 + $0x8] sm:$0xff] %v3043_v61 }

</bundles_post_ra>
